<compile_context>
chip_gen: v6e
topology: v6e:2x2x1
jax: 0.10.0
libtpu: 0.0.40
codegen_flags: <defaults>
</compile_context>

<pallas_src>
import functools

import jax
import jax.numpy as jnp
from jax.experimental import pallas as pl
from jax.experimental.pallas import tpu as pltpu

NEG_SLOPE = 0.2          # nn.LeakyReLU(negative_slope=0.2)
BN_EPS = 1e-5            # nn.BatchNorm1d default eps
LANE = 128


def _round_up(x, m):
    return (x + m - 1) // m * m


def _leaky_relu(x):
    return jnp.where(x > 0, x, NEG_SLOPE * x)


def _bn_leaky_block(h_f32, w_ref, g_ref, be_ref):
    """Linear (bf16 MXU, f32 acc) -> folded training-mode BN -> LeakyReLU.

    Linear bias intentionally omitted (cancelled by BN mean subtraction).
    One-pass statistics halve the cross-sublane (XLU) reductions per layer.
    """
    z = jnp.dot(h_f32.astype(jnp.bfloat16), w_ref[...],
                preferred_element_type=jnp.float32)
    mean = jnp.mean(z, axis=0, keepdims=True)
    mean_sq = jnp.mean(z * z, axis=0, keepdims=True)
    var = mean_sq - mean * mean
    scale = g_ref[...] * jax.lax.rsqrt(var + BN_EPS)
    shift = be_ref[...] - mean * scale
    return _leaky_relu(z * scale + shift)


def generator_kernel(x_ref,
                     w1_ref, b1_ref,
                     w2_ref, g2_ref, be2_ref,
                     w3_ref, g3_ref, be3_ref,
                     w4_ref, g4_ref, be4_ref,
                     w5_ref, g5_ref, be5_ref,
                     w6_ref, b6_ref,
                     out_ref):
    x = x_ref[...]                                    # [N, 128] bf16 (padded)

    # Linear(74p128 -> 128) + bias + LeakyReLU
    h = jnp.dot(x, w1_ref[...], preferred_element_type=jnp.float32) + b1_ref[...]
    h = _leaky_relu(h)

    # 4 x (Linear + BatchNorm(train) + LeakyReLU), BN folded into one FMA
    h = _bn_leaky_block(h, w2_ref, g2_ref, be2_ref)   # 128 -> 256
    h = _bn_leaky_block(h, w3_ref, g3_ref, be3_ref)   # 256 -> 256
    h = _bn_leaky_block(h, w4_ref, g4_ref, be4_ref)   # 256 -> 512
    h = _bn_leaky_block(h, w5_ref, g5_ref, be5_ref)   # 512 -> 256

    # Linear(256 -> out_pad) + bias + Tanh (lane-dense padded output)
    h = jnp.dot(h.astype(jnp.bfloat16), w6_ref[...],
                preferred_element_type=jnp.float32) + b6_ref[...]
    out_ref[...] = jnp.tanh(h)


def init_params(key, *, num_classes, channels, input_size, noise_dim=64):
    """Synthetic f32 parameters matching the PyTorch __init__ shapes.

    Linear weights ~ kaiming_normal (std=sqrt(2/fan_in)) scaled by 0.1, bias 0.
    BatchNorm: gamma=1, beta=0.  Embedding ~ N(0, 1).
    Weights stored [in, out] (transposed vs. PyTorch) for x @ W.
    """
    dims = [noise_dim + num_classes, 128, 256, 256, 512, 256, channels * input_size]
    keys = jax.random.split(key, 7)
    params = {"emb": jax.random.normal(keys[0], (num_classes, num_classes), jnp.float32)}
    for i in range(6):
        fan_in, fan_out = dims[i], dims[i + 1]
        w = jax.random.normal(keys[i + 1], (fan_in, fan_out), jnp.float32)
        params[f"w{i + 1}"] = w * jnp.sqrt(2.0 / fan_in) * 0.1
        params[f"b{i + 1}"] = jnp.zeros((1, fan_out), jnp.float32)
    for i in (2, 3, 4, 5):  # BatchNorm layers follow linears 2..5
        params[f"g{i}"] = jnp.ones((1, dims[i]), jnp.float32)
        params[f"be{i}"] = jnp.zeros((1, dims[i]), jnp.float32)
    return params


def prepare_kernel_params(params):
    """Pad to lane-aligned shapes and cast matmul weights to bf16 (one-time)."""
    in_dim = params["w1"].shape[0]
    out_dim = params["w6"].shape[1]
    k_pad = _round_up(in_dim, LANE)
    out_pad = _round_up(out_dim, LANE)

    kp = {
        "w1": jnp.pad(params["w1"], ((0, k_pad - in_dim), (0, 0))).astype(jnp.bfloat16),
        "b1": params["b1"],
        "w6": jnp.pad(params["w6"], ((0, 0), (0, out_pad - out_dim))).astype(jnp.bfloat16),
        "b6": jnp.pad(params["b6"], ((0, 0), (0, out_pad - out_dim))),
    }
    for i in (2, 3, 4, 5):
        kp[f"w{i}"] = params[f"w{i}"].astype(jnp.bfloat16)
        kp[f"g{i}"] = params[f"g{i}"]
        kp[f"be{i}"] = params[f"be{i}"]
        # b2..b5 dropped: cancelled by training-mode BN mean subtraction (zeros anyway).
    return kp


@functools.partial(jax.jit, static_argnames=("channels", "input_size"))
def generator_forward(inputs, labels, emb, kp, *, channels, input_size):
    # Glue: embedding gather + concat + lane pad (cheap), then fused MLP kernel.
    condition = jnp.take(emb, labels, axis=0)                        # [N, nc]
    x = jnp.concatenate([inputs, condition], axis=-1)                # [N, 64+nc]
    n, k = x.shape
    k_pad = kp["w1"].shape[0]
    out_pad = kp["w6"].shape[1]
    out_dim = channels * input_size

    x = jnp.pad(x, ((0, 0), (0, k_pad - k))).astype(jnp.bfloat16)    # [N, 128] bf16

    args = [
        x,
        kp["w1"], kp["b1"],
        kp["w2"], kp["g2"], kp["be2"],
        kp["w3"], kp["g3"], kp["be3"],
        kp["w4"], kp["g4"], kp["be4"],
        kp["w5"], kp["b6"] if False else kp["be5"],  # placeholder never taken
        kp["w6"], kp["b6"],
    ]
    # Fix arg list explicitly (readability over cleverness):
    args = [
        x,
        kp["w1"], kp["b1"],
        kp["w2"], kp["g2"], kp["be2"],
        kp["w3"], kp["g3"], kp["be3"],
        kp["w4"], kp["g4"], kp["be4"],
        kp["w5"], kp["g5"], kp["be5"],
        kp["w6"], kp["b6"],
    ]

    vmem = pl.BlockSpec(memory_space=pltpu.MemorySpace.VMEM)

    dims = [k_pad, 128, 256, 256, 512, 256, out_pad]
    mac = sum(dims[i] * dims[i + 1] for i in range(6))
    cost = pl.CostEstimate(
        flops=2 * n * mac,
        transcendentals=n * out_pad + (256 + 256 + 512 + 256),       # tanh + rsqrt
        bytes_accessed=2 * mac                                        # bf16 weights
        + 4 * (128 + out_pad + 2 * (256 + 256 + 512 + 256))           # f32 vectors
        + n * k_pad * 2 + n * out_pad * 4,                            # x in, out
    )

    out = pl.pallas_call(
        generator_kernel,
        out_shape=jax.ShapeDtypeStruct((n, out_pad), jnp.float32),
        in_specs=[vmem] * len(args),
        out_specs=vmem,
        cost_estimate=cost,
        compiler_params=pltpu.CompilerParams(vmem_limit_bytes=32 * 1024 * 1024),
    )(*args)

    # Slice away the lane padding and reshape to the PyTorch (N, C, L) layout.
    return out[:, :out_dim].reshape(n, channels, input_size)


def generator_reference(inputs, labels, params, *, channels, input_size):
    """Pure-JAX f32 reference with the exact PyTorch-module math (training mode)."""
    condition = jnp.take(params["emb"], labels, axis=0)
    h = jnp.concatenate([inputs, condition], axis=-1)
    h = h @ params["w1"] + params["b1"]
    h = jnp.where(h > 0, h, NEG_SLOPE * h)
    for i in (2, 3, 4, 5):
        h = h @ params[f"w{i}"] + params[f"b{i}"]
        mean = jnp.mean(h, axis=0, keepdims=True)
        var = jnp.mean((h - mean) ** 2, axis=0, keepdims=True)
        h = (h - mean) * jax.lax.rsqrt(var + BN_EPS) * params[f"g{i}"] + params[f"be{i}"]
        h = jnp.where(h > 0, h, NEG_SLOPE * h)
    h = h @ params["w6"] + params["b6"]
    return jnp.tanh(h).reshape(h.shape[0], channels, input_size)


if __name__ == "__main__":
    # Small shapes consistent with the module: noise dim 64, num_classes 10,
    # channels 1, input_size 32, batch 8.
    NUM_CLASSES = 10
    CHANNELS = 1
    INPUT_SIZE = 32
    NOISE_DIM = 64
    BATCH = 8

    key = jax.random.PRNGKey(0)
    k_param, k_noise, k_label = jax.random.split(key, 3)

    params = init_params(k_param, num_classes=NUM_CLASSES, channels=CHANNELS,
                         input_size=INPUT_SIZE, noise_dim=NOISE_DIM)
    kparams = prepare_kernel_params(params)
    noise = jax.random.normal(k_noise, (BATCH, NOISE_DIM), jnp.float32)
    labels = jax.random.randint(k_label, (BATCH,), 0, NUM_CLASSES, jnp.int32)

    out = generator_forward(noise, labels, params["emb"], kparams,
                            channels=CHANNELS, input_size=INPUT_SIZE)
    out = jax.block_until_ready(out)

    assert out.shape == (BATCH, CHANNELS, INPUT_SIZE)
    assert bool(jnp.all(jnp.isfinite(out)))

    # Loose tolerance vs. the f32 reference (bf16 weights => ~1e-2 rel deviation).
    ref = generator_reference(noise, labels, params,
                              channels=CHANNELS, input_size=INPUT_SIZE)
    max_diff = float(jnp.max(jnp.abs(out - ref)))
    assert max_diff < 5e-2, f"max abs diff vs reference too large: {max_diff}"

    print("KERNEL_OK")
</pallas_src>

<mosaic_0001>
module attributes {stable_mosaic.version = 11 : i64} {
  func.func @generator_kernel(%arg0: memref<8x128xbf16, #tpu.memory_space<vmem>>, %arg1: memref<128x128xbf16, #tpu.memory_space<vmem>>, %arg2: memref<1x128xf32, #tpu.memory_space<vmem>>, %arg3: memref<128x256xbf16, #tpu.memory_space<vmem>>, %arg4: memref<1x256xf32, #tpu.memory_space<vmem>>, %arg5: memref<1x256xf32, #tpu.memory_space<vmem>>, %arg6: memref<256x256xbf16, #tpu.memory_space<vmem>>, %arg7: memref<1x256xf32, #tpu.memory_space<vmem>>, %arg8: memref<1x256xf32, #tpu.memory_space<vmem>>, %arg9: memref<256x512xbf16, #tpu.memory_space<vmem>>, %arg10: memref<1x512xf32, #tpu.memory_space<vmem>>, %arg11: memref<1x512xf32, #tpu.memory_space<vmem>>, %arg12: memref<512x256xbf16, #tpu.memory_space<vmem>>, %arg13: memref<1x256xf32, #tpu.memory_space<vmem>>, %arg14: memref<1x256xf32, #tpu.memory_space<vmem>>, %arg15: memref<256x128xbf16, #tpu.memory_space<vmem>>, %arg16: memref<1x128xf32, #tpu.memory_space<vmem>>, %arg17: memref<8x128xf32, #tpu.memory_space<vmem>>) attributes {dimension_semantics = [], scalar_prefetch = 0 : i64, scratch_operands = 0 : i64, tpu.core_type = #tpu.core_type<tc>} {
    %c0 = arith.constant 0 : index
    %c0_0 = arith.constant 0 : index
    %0 = vector.load %arg0[%c0, %c0_0] : memref<8x128xbf16, #tpu.memory_space<vmem>>, vector<8x128xbf16>
    %c0_1 = arith.constant 0 : index
    %c0_2 = arith.constant 0 : index
    %1 = vector.load %arg1[%c0_1, %c0_2] : memref<128x128xbf16, #tpu.memory_space<vmem>>, vector<128x128xbf16>
    %cst = arith.constant dense<0.000000e+00> : vector<8x128xf32>
    %2 = tpu.matmul %0, %1, %cst {dimension_numbers = #tpu.dot_dimension_numbers<[1], [0], [0], [1], [0, 0, 1, 1], [], []>} : vector<8x128xbf16>, vector<128x128xbf16>, vector<8x128xf32> -> vector<8x128xf32>
    %c0_3 = arith.constant 0 : index
    %c0_4 = arith.constant 0 : index
    %3 = vector.load %arg2[%c0_3, %c0_4] : memref<1x128xf32, #tpu.memory_space<vmem>>, vector<1x128xf32>
    %4 = vector.broadcast %3 : vector<1x128xf32> to vector<8x128xf32>
    %5 = arith.addf %2, %4 : vector<8x128xf32>
    %cst_5 = arith.constant 0.000000e+00 : f32
    %6 = vector.broadcast %cst_5 : f32 to vector<8x128xf32>
    %7 = arith.cmpf ogt, %5, %6 : vector<8x128xf32>
    %cst_6 = arith.constant 2.000000e-01 : f32
    %8 = vector.broadcast %cst_6 : f32 to vector<8x128xf32>
    %9 = arith.mulf %8, %5 : vector<8x128xf32>
    %10 = arith.select %7, %5, %9 : vector<8x128xi1>, vector<8x128xf32>
    %11 = arith.truncf %10 : vector<8x128xf32> to vector<8x128xbf16>
    %c0_7 = arith.constant 0 : index
    %c0_8 = arith.constant 0 : index
    %12 = vector.load %arg3[%c0_7, %c0_8] : memref<128x256xbf16, #tpu.memory_space<vmem>>, vector<128x256xbf16>
    %cst_9 = arith.constant dense<0.000000e+00> : vector<8x256xf32>
    %13 = tpu.matmul %11, %12, %cst_9 {dimension_numbers = #tpu.dot_dimension_numbers<[1], [0], [0], [1], [0, 0, 1, 1], [], []>} : vector<8x128xbf16>, vector<128x256xbf16>, vector<8x256xf32> -> vector<8x256xf32>
    %cst_10 = arith.constant dense<0.000000e+00> : vector<256xf32>
    %14 = vector.multi_reduction <add>, %13, %cst_10 [0] : vector<8x256xf32> to vector<256xf32>
    %15 = vector.shape_cast %14 : vector<256xf32> to vector<1x256xf32>
    %cst_11 = arith.constant 8.000000e+00 : f32
    %16 = vector.broadcast %cst_11 : f32 to vector<1x256xf32>
    %17 = arith.divf %15, %16 : vector<1x256xf32>
    %18 = arith.mulf %13, %13 : vector<8x256xf32>
    %cst_12 = arith.constant dense<0.000000e+00> : vector<256xf32>
    %19 = vector.multi_reduction <add>, %18, %cst_12 [0] : vector<8x256xf32> to vector<256xf32>
    %20 = vector.shape_cast %19 : vector<256xf32> to vector<1x256xf32>
    %cst_13 = arith.constant 8.000000e+00 : f32
    %21 = vector.broadcast %cst_13 : f32 to vector<1x256xf32>
    %22 = arith.divf %20, %21 : vector<1x256xf32>
    %23 = arith.mulf %17, %17 : vector<1x256xf32>
    %24 = arith.subf %22, %23 : vector<1x256xf32>
    %c0_14 = arith.constant 0 : index
    %c0_15 = arith.constant 0 : index
    %25 = vector.load %arg4[%c0_14, %c0_15] : memref<1x256xf32, #tpu.memory_space<vmem>>, vector<1x256xf32>
    %cst_16 = arith.constant 9.99999974E-6 : f32
    %26 = vector.broadcast %cst_16 : f32 to vector<1x256xf32>
    %27 = arith.addf %24, %26 : vector<1x256xf32>
    %28 = math.rsqrt %27 : vector<1x256xf32>
    %29 = arith.mulf %25, %28 : vector<1x256xf32>
    %c0_17 = arith.constant 0 : index
    %c0_18 = arith.constant 0 : index
    %30 = vector.load %arg5[%c0_17, %c0_18] : memref<1x256xf32, #tpu.memory_space<vmem>>, vector<1x256xf32>
    %31 = arith.mulf %17, %29 : vector<1x256xf32>
    %32 = arith.subf %30, %31 : vector<1x256xf32>
    %33 = vector.broadcast %29 : vector<1x256xf32> to vector<8x256xf32>
    %34 = arith.mulf %13, %33 : vector<8x256xf32>
    %35 = vector.broadcast %32 : vector<1x256xf32> to vector<8x256xf32>
    %36 = arith.addf %34, %35 : vector<8x256xf32>
    %cst_19 = arith.constant 0.000000e+00 : f32
    %37 = vector.broadcast %cst_19 : f32 to vector<8x256xf32>
    %38 = arith.cmpf ogt, %36, %37 : vector<8x256xf32>
    %cst_20 = arith.constant 2.000000e-01 : f32
    %39 = vector.broadcast %cst_20 : f32 to vector<8x256xf32>
    %40 = arith.mulf %39, %36 : vector<8x256xf32>
    %41 = arith.select %38, %36, %40 : vector<8x256xi1>, vector<8x256xf32>
    %42 = arith.truncf %41 : vector<8x256xf32> to vector<8x256xbf16>
    %c0_21 = arith.constant 0 : index
    %c0_22 = arith.constant 0 : index
    %43 = vector.load %arg6[%c0_21, %c0_22] : memref<256x256xbf16, #tpu.memory_space<vmem>>, vector<256x256xbf16>
    %cst_23 = arith.constant dense<0.000000e+00> : vector<8x256xf32>
    %44 = tpu.matmul %42, %43, %cst_23 {dimension_numbers = #tpu.dot_dimension_numbers<[1], [0], [0], [1], [0, 0, 1, 1], [], []>} : vector<8x256xbf16>, vector<256x256xbf16>, vector<8x256xf32> -> vector<8x256xf32>
    %cst_24 = arith.constant dense<0.000000e+00> : vector<256xf32>
    %45 = vector.multi_reduction <add>, %44, %cst_24 [0] : vector<8x256xf32> to vector<256xf32>
    %46 = vector.shape_cast %45 : vector<256xf32> to vector<1x256xf32>
    %cst_25 = arith.constant 8.000000e+00 : f32
    %47 = vector.broadcast %cst_25 : f32 to vector<1x256xf32>
    %48 = arith.divf %46, %47 : vector<1x256xf32>
    %49 = arith.mulf %44, %44 : vector<8x256xf32>
    %cst_26 = arith.constant dense<0.000000e+00> : vector<256xf32>
    %50 = vector.multi_reduction <add>, %49, %cst_26 [0] : vector<8x256xf32> to vector<256xf32>
    %51 = vector.shape_cast %50 : vector<256xf32> to vector<1x256xf32>
    %cst_27 = arith.constant 8.000000e+00 : f32
    %52 = vector.broadcast %cst_27 : f32 to vector<1x256xf32>
    %53 = arith.divf %51, %52 : vector<1x256xf32>
    %54 = arith.mulf %48, %48 : vector<1x256xf32>
    %55 = arith.subf %53, %54 : vector<1x256xf32>
    %c0_28 = arith.constant 0 : index
    %c0_29 = arith.constant 0 : index
    %56 = vector.load %arg7[%c0_28, %c0_29] : memref<1x256xf32, #tpu.memory_space<vmem>>, vector<1x256xf32>
    %cst_30 = arith.constant 9.99999974E-6 : f32
    %57 = vector.broadcast %cst_30 : f32 to vector<1x256xf32>
    %58 = arith.addf %55, %57 : vector<1x256xf32>
    %59 = math.rsqrt %58 : vector<1x256xf32>
    %60 = arith.mulf %56, %59 : vector<1x256xf32>
    %c0_31 = arith.constant 0 : index
    %c0_32 = arith.constant 0 : index
    %61 = vector.load %arg8[%c0_31, %c0_32] : memref<1x256xf32, #tpu.memory_space<vmem>>, vector<1x256xf32>
    %62 = arith.mulf %48, %60 : vector<1x256xf32>
    %63 = arith.subf %61, %62 : vector<1x256xf32>
    %64 = vector.broadcast %60 : vector<1x256xf32> to vector<8x256xf32>
    %65 = arith.mulf %44, %64 : vector<8x256xf32>
    %66 = vector.broadcast %63 : vector<1x256xf32> to vector<8x256xf32>
    %67 = arith.addf %65, %66 : vector<8x256xf32>
    %cst_33 = arith.constant 0.000000e+00 : f32
    %68 = vector.broadcast %cst_33 : f32 to vector<8x256xf32>
    %69 = arith.cmpf ogt, %67, %68 : vector<8x256xf32>
    %cst_34 = arith.constant 2.000000e-01 : f32
    %70 = vector.broadcast %cst_34 : f32 to vector<8x256xf32>
    %71 = arith.mulf %70, %67 : vector<8x256xf32>
    %72 = arith.select %69, %67, %71 : vector<8x256xi1>, vector<8x256xf32>
    %73 = arith.truncf %72 : vector<8x256xf32> to vector<8x256xbf16>
    %c0_35 = arith.constant 0 : index
    %c0_36 = arith.constant 0 : index
    %74 = vector.load %arg9[%c0_35, %c0_36] : memref<256x512xbf16, #tpu.memory_space<vmem>>, vector<256x512xbf16>
    %cst_37 = arith.constant dense<0.000000e+00> : vector<8x512xf32>
    %75 = tpu.matmul %73, %74, %cst_37 {dimension_numbers = #tpu.dot_dimension_numbers<[1], [0], [0], [1], [0, 0, 1, 1], [], []>} : vector<8x256xbf16>, vector<256x512xbf16>, vector<8x512xf32> -> vector<8x512xf32>
    %cst_38 = arith.constant dense<0.000000e+00> : vector<512xf32>
    %76 = vector.multi_reduction <add>, %75, %cst_38 [0] : vector<8x512xf32> to vector<512xf32>
    %77 = vector.shape_cast %76 : vector<512xf32> to vector<1x512xf32>
    %cst_39 = arith.constant 8.000000e+00 : f32
    %78 = vector.broadcast %cst_39 : f32 to vector<1x512xf32>
    %79 = arith.divf %77, %78 : vector<1x512xf32>
    %80 = arith.mulf %75, %75 : vector<8x512xf32>
    %cst_40 = arith.constant dense<0.000000e+00> : vector<512xf32>
    %81 = vector.multi_reduction <add>, %80, %cst_40 [0] : vector<8x512xf32> to vector<512xf32>
    %82 = vector.shape_cast %81 : vector<512xf32> to vector<1x512xf32>
    %cst_41 = arith.constant 8.000000e+00 : f32
    %83 = vector.broadcast %cst_41 : f32 to vector<1x512xf32>
    %84 = arith.divf %82, %83 : vector<1x512xf32>
    %85 = arith.mulf %79, %79 : vector<1x512xf32>
    %86 = arith.subf %84, %85 : vector<1x512xf32>
    %c0_42 = arith.constant 0 : index
    %c0_43 = arith.constant 0 : index
    %87 = vector.load %arg10[%c0_42, %c0_43] : memref<1x512xf32, #tpu.memory_space<vmem>>, vector<1x512xf32>
    %cst_44 = arith.constant 9.99999974E-6 : f32
    %88 = vector.broadcast %cst_44 : f32 to vector<1x512xf32>
    %89 = arith.addf %86, %88 : vector<1x512xf32>
    %90 = math.rsqrt %89 : vector<1x512xf32>
    %91 = arith.mulf %87, %90 : vector<1x512xf32>
    %c0_45 = arith.constant 0 : index
    %c0_46 = arith.constant 0 : index
    %92 = vector.load %arg11[%c0_45, %c0_46] : memref<1x512xf32, #tpu.memory_space<vmem>>, vector<1x512xf32>
    %93 = arith.mulf %79, %91 : vector<1x512xf32>
    %94 = arith.subf %92, %93 : vector<1x512xf32>
    %95 = vector.broadcast %91 : vector<1x512xf32> to vector<8x512xf32>
    %96 = arith.mulf %75, %95 : vector<8x512xf32>
    %97 = vector.broadcast %94 : vector<1x512xf32> to vector<8x512xf32>
    %98 = arith.addf %96, %97 : vector<8x512xf32>
    %cst_47 = arith.constant 0.000000e+00 : f32
    %99 = vector.broadcast %cst_47 : f32 to vector<8x512xf32>
    %100 = arith.cmpf ogt, %98, %99 : vector<8x512xf32>
    %cst_48 = arith.constant 2.000000e-01 : f32
    %101 = vector.broadcast %cst_48 : f32 to vector<8x512xf32>
    %102 = arith.mulf %101, %98 : vector<8x512xf32>
    %103 = arith.select %100, %98, %102 : vector<8x512xi1>, vector<8x512xf32>
    %104 = arith.truncf %103 : vector<8x512xf32> to vector<8x512xbf16>
    %c0_49 = arith.constant 0 : index
    %c0_50 = arith.constant 0 : index
    %105 = vector.load %arg12[%c0_49, %c0_50] : memref<512x256xbf16, #tpu.memory_space<vmem>>, vector<512x256xbf16>
    %cst_51 = arith.constant dense<0.000000e+00> : vector<8x256xf32>
    %106 = tpu.matmul %104, %105, %cst_51 {dimension_numbers = #tpu.dot_dimension_numbers<[1], [0], [0], [1], [0, 0, 1, 1], [], []>} : vector<8x512xbf16>, vector<512x256xbf16>, vector<8x256xf32> -> vector<8x256xf32>
    %cst_52 = arith.constant dense<0.000000e+00> : vector<256xf32>
    %107 = vector.multi_reduction <add>, %106, %cst_52 [0] : vector<8x256xf32> to vector<256xf32>
    %108 = vector.shape_cast %107 : vector<256xf32> to vector<1x256xf32>
    %cst_53 = arith.constant 8.000000e+00 : f32
    %109 = vector.broadcast %cst_53 : f32 to vector<1x256xf32>
    %110 = arith.divf %108, %109 : vector<1x256xf32>
    %111 = arith.mulf %106, %106 : vector<8x256xf32>
    %cst_54 = arith.constant dense<0.000000e+00> : vector<256xf32>
    %112 = vector.multi_reduction <add>, %111, %cst_54 [0] : vector<8x256xf32> to vector<256xf32>
    %113 = vector.shape_cast %112 : vector<256xf32> to vector<1x256xf32>
    %cst_55 = arith.constant 8.000000e+00 : f32
    %114 = vector.broadcast %cst_55 : f32 to vector<1x256xf32>
    %115 = arith.divf %113, %114 : vector<1x256xf32>
    %116 = arith.mulf %110, %110 : vector<1x256xf32>
    %117 = arith.subf %115, %116 : vector<1x256xf32>
    %c0_56 = arith.constant 0 : index
    %c0_57 = arith.constant 0 : index
    %118 = vector.load %arg13[%c0_56, %c0_57] : memref<1x256xf32, #tpu.memory_space<vmem>>, vector<1x256xf32>
    %cst_58 = arith.constant 9.99999974E-6 : f32
    %119 = vector.broadcast %cst_58 : f32 to vector<1x256xf32>
    %120 = arith.addf %117, %119 : vector<1x256xf32>
    %121 = math.rsqrt %120 : vector<1x256xf32>
    %122 = arith.mulf %118, %121 : vector<1x256xf32>
    %c0_59 = arith.constant 0 : index
    %c0_60 = arith.constant 0 : index
    %123 = vector.load %arg14[%c0_59, %c0_60] : memref<1x256xf32, #tpu.memory_space<vmem>>, vector<1x256xf32>
    %124 = arith.mulf %110, %122 : vector<1x256xf32>
    %125 = arith.subf %123, %124 : vector<1x256xf32>
    %126 = vector.broadcast %122 : vector<1x256xf32> to vector<8x256xf32>
    %127 = arith.mulf %106, %126 : vector<8x256xf32>
    %128 = vector.broadcast %125 : vector<1x256xf32> to vector<8x256xf32>
    %129 = arith.addf %127, %128 : vector<8x256xf32>
    %cst_61 = arith.constant 0.000000e+00 : f32
    %130 = vector.broadcast %cst_61 : f32 to vector<8x256xf32>
    %131 = arith.cmpf ogt, %129, %130 : vector<8x256xf32>
    %cst_62 = arith.constant 2.000000e-01 : f32
    %132 = vector.broadcast %cst_62 : f32 to vector<8x256xf32>
    %133 = arith.mulf %132, %129 : vector<8x256xf32>
    %134 = arith.select %131, %129, %133 : vector<8x256xi1>, vector<8x256xf32>
    %135 = arith.truncf %134 : vector<8x256xf32> to vector<8x256xbf16>
    %c0_63 = arith.constant 0 : index
    %c0_64 = arith.constant 0 : index
    %136 = vector.load %arg15[%c0_63, %c0_64] : memref<256x128xbf16, #tpu.memory_space<vmem>>, vector<256x128xbf16>
    %cst_65 = arith.constant dense<0.000000e+00> : vector<8x128xf32>
    %137 = tpu.matmul %135, %136, %cst_65 {dimension_numbers = #tpu.dot_dimension_numbers<[1], [0], [0], [1], [0, 0, 1, 1], [], []>} : vector<8x256xbf16>, vector<256x128xbf16>, vector<8x128xf32> -> vector<8x128xf32>
    %c0_66 = arith.constant 0 : index
    %c0_67 = arith.constant 0 : index
    %138 = vector.load %arg16[%c0_66, %c0_67] : memref<1x128xf32, #tpu.memory_space<vmem>>, vector<1x128xf32>
    %139 = vector.broadcast %138 : vector<1x128xf32> to vector<8x128xf32>
    %140 = arith.addf %137, %139 : vector<8x128xf32>
    %141 = math.tanh %140 : vector<8x128xf32>
    %c0_68 = arith.constant 0 : index
    %c0_69 = arith.constant 0 : index
    %142 = vector.load %arg17[%c0_68, %c0_69] : memref<8x128xf32, #tpu.memory_space<vmem>>, vector<8x128xf32>
    tpu.vector_store %arg17[%c0_68, %c0_69], %141 {strides = array<i32>} : memref<8x128xf32, #tpu.memory_space<vmem>>, vector<8x128xf32>,
    return
  }
}

</mosaic_0001>

<bundles_post_ra>
// kernel: generator_forward.1
= control target key start
LH: loop header
LB: loop body
LE: loop exit
PB: predicated region body
PF: predicated region fallthrough
CT: control target
= control target key end

     0   :  { %s3273_s0 = inlined_call_operand.vmem [shape: bf16[8,128], index: 0, kind: input, shape index: {}]   ;;  %s3274_s1 = inlined_call_operand.vmem [shape: bf16[128,128], index: 1, kind: input, shape index: {}]   ;;  %s3275_s2 = inlined_call_operand.vmem [shape: f32[1,128], index: 2, kind: input, shape index: {}]   ;;  %s3276_s3 = inlined_call_operand.hbm [shape: bf16[128,256], index: 3, kind: input, shape index: {}]   ;;  %s3277_s4 = inlined_call_operand.vmem [shape: f32[1,256], index: 4, kind: input, shape index: {}]   ;;  %s3278_s5 = inlined_call_operand.vmem [shape: f32[1,256], index: 5, kind: input, shape index: {}]   ;;  %s3279_s6 = inlined_call_operand.hbm [shape: bf16[256,256], index: 6, kind: input, shape index: {}]   ;;  %s3280_s7 = inlined_call_operand.vmem [shape: f32[1,256], index: 7, kind: input, shape index: {}]   ;;  %s3281_s8 = inlined_call_operand.vmem [shape: f32[1,256], index: 8, kind: input, shape index: {}]   ;;  %s3282_s9 = inlined_call_operand.hbm [shape: bf16[256,512], index: 9, kind: input, shape index: {}]   ;;  %s3283_s10 = inlined_call_operand.vmem [shape: f32[1,512], index: 10, kind: input, shape index: {}]   ;;  %s3284_s11 = inlined_call_operand.vmem [shape: f32[1,512], index: 11, kind: input, shape index: {}]   ;;  %s3285_s12 = inlined_call_operand.hbm [shape: bf16[512,256], index: 12, kind: input, shape index: {}]   ;;  %s3286_s13 = inlined_call_operand.vmem [shape: f32[1,256], index: 13, kind: input, shape index: {}]   ;;  %s3287_s14 = inlined_call_operand.vmem [shape: f32[1,256], index: 14, kind: input, shape index: {}]   ;;  %s3288_s15 = inlined_call_operand.hbm [shape: bf16[256,128], index: 15, kind: input, shape index: {}]   ;;  %s3289_s16 = inlined_call_operand.vmem [shape: f32[1,128], index: 16, kind: input, shape index: {}]   ;;  %s3290_s17 = inlined_call_operand.hbm [shape: f32[8,128], index: 17, kind: output, shape index: {}]  }
   0x1   :  { %3292 = sst [smem:[#allocation16_spill]] %s3273_s0 }
   0x2   :  { %3293 = sst [smem:[#allocation17_spill]] %s3274_s1 }
   0x3   :  { %22 = vsyncpa [#allocation3], 0 }
   0x4   :  { %23 = vsyncpa [#allocation6], 0 }
   0x5   :  { %24 = vsyncpa [#allocation9], 0 }
   0x6   :  { %25 = vsyncpa [#allocation4], 0  ;;  %s2996_s24 = smov [#allocation5]   ;;  %s2997_s26 = smov [#allocation8]  }
   0x7   :  { %s53_s25 = sshll.u32 %s2996_s24, 4  ;;  %s85_s27 = sshll.u32 %s2997_s26, 4  ;;  %s54_s25 = int_to_ptr.vmem [resolvable:$true] %s53_s25  ;;  %s86_s27 = int_to_ptr.vmem [resolvable:$true] %s85_s27 }
   0x8   :  { %s2876_s28 = scalar_lea.vmem %s54_s25, 4096  ;;  %p2881_p1 = scmp.lt.s32.totalorder %s54_s25, %s54_s25 }
   0x9   :  { %p2877_p0 = scmp.ne.s32.totalorder %s54_s25, %s2876_s28  ;;  %p2882_p2 = scmp.lt.s32.totalorder %s2876_s28, %s2876_s28 }
   0xb   :  { %p2883_p3 = por %p2882_p2, %p2881_p1 }
   0xd   :  { %p2884_p4 = pnand %p2883_p3, %p2877_p0 }
   0xf   :  { %2887 = shalt.err (!%p2884_p4)
}
  0x10   :  { %s2998_s29 = smov 128   ;;  %s2999_s0 = smov 8  }
  0x11   :  { %59 = dma.hbm_to_vmem [thread:$0]  %s3279_s6, 4096, %s54_s25, [#allocation6], %s2998_s29, %s2998_s29, %s2999_s0  }
  0x12   :  { %s2896_s19 = scalar_lea.vmem %s86_s27, 8192  ;;  %p2901_p6 = scmp.lt.s32.totalorder %s86_s27, %s86_s27 }
  0x13   :  { %p2897_p5 = scmp.ne.s32.totalorder %s86_s27, %s2896_s19  ;;  %p2902_p7 = scmp.lt.s32.totalorder %s2896_s19, %s2896_s19 }
  0x15   :  { %p2903_p8 = por %p2902_p7, %p2901_p6 }
  0x17   :  { %p2904_p9 = pnand %p2903_p8, %p2897_p5 }
  0x19   :  { %2907 = shalt.err (!%p2904_p9)
}
  0x1a   :  { %91 = dma.hbm_to_vmem [thread:$0]  %s3285_s12, 8192, %s86_s27, [#allocation9], %s2998_s29, %s2998_s29, %s2999_s0  }
  0x1b   :  { %s3000_s21 = smov [#allocation2]   ;;  %s3001_s23 = smov [#allocation7]  }
  0x1c   :  { %s37_s22 = sshll.u32 %s3000_s21, 4  ;;  %s69_s24 = sshll.u32 %s3001_s23, 4  ;;  %s38_s22 = int_to_ptr.vmem [resolvable:$true] %s37_s22  ;;  %s70_s24 = int_to_ptr.vmem [resolvable:$true] %s69_s24 }
  0x1d   :  { %s2916_s26 = scalar_lea.vmem %s38_s22, 2048  ;;  %p2921_p11 = scmp.lt.s32.totalorder %s38_s22, %s38_s22 }
  0x1e   :  { %p2917_p10 = scmp.ne.s32.totalorder %s38_s22, %s2916_s26  ;;  %p2922_p12 = scmp.lt.s32.totalorder %s2916_s26, %s2916_s26 }
  0x20   :  { %p2923_p13 = por %p2922_p12, %p2921_p11 }
  0x22   :  { %p2924_p0 = pnand %p2923_p13, %p2917_p10 }
  0x24   :  { %2927 = shalt.err (!%p2924_p0)
}
  0x25   :  { %43 = dma.hbm_to_vmem [thread:$0]  %s3276_s3, 2048, %s38_s22, [#allocation3], %s2998_s29, %s2998_s29, %s2999_s0  }
  0x26   :  { %s2936_s28 = scalar_lea.vmem %s70_s24, 8192  ;;  %p2941_p2 = scmp.lt.s32.totalorder %s70_s24, %s70_s24 }
  0x27   :  { %p2937_p1 = scmp.ne.s32.totalorder %s70_s24, %s2936_s28  ;;  %p2942_p3 = scmp.lt.s32.totalorder %s2936_s28, %s2936_s28 }
  0x29   :  { %p2943_p4 = por %p2942_p3, %p2941_p2 }
  0x2b   :  { %p2944_p5 = pnand %p2943_p4, %p2937_p1 }
  0x2d   :  { %2947 = shalt.err (!%p2944_p5)
}
  0x2e   :  { %s3002_s12 = smov 256   ;;  %s3003_s27 = smov 16  }
  0x2f   :  { %75 = dma.hbm_to_vmem [thread:$0]  %s3282_s9, 8192, %s70_s24, [#allocation6], %s3002_s12, %s3002_s12, %s3003_s27  }
  0x30   :  { %s3004_s19 = smov [#allocation10]  }
  0x31   :  { %s101_s1 = sshll.u32 %s3004_s19, 4  ;;  %s102_s1 = int_to_ptr.vmem [resolvable:$true] %s101_s1 }
  0x32   :  { %s2956_s20 = scalar_lea.vmem %s102_s1, 2048  ;;  %p2961_p7 = scmp.lt.s32.totalorder %s102_s1, %s102_s1 }
  0x33   :  { %p2957_p6 = scmp.ne.s32.totalorder %s102_s1, %s2956_s20  ;;  %p2962_p8 = scmp.lt.s32.totalorder %s2956_s20, %s2956_s20 }
  0x35   :  { %p2963_p9 = por %p2962_p8, %p2961_p7 }
  0x37   :  { %p2964_p10 = pnand %p2963_p9, %p2957_p6 }
  0x39   :  { %2967 = shalt.err (!%p2964_p10)
}
  0x3a   :  { %s3005_s3 = smov 64   ;;  %s3006_s29 = smov 4  }
  0x3b   :  { %107 = dma.hbm_to_vmem [thread:$0]  %s3288_s15, 2048, %s102_s1, [#allocation9], %s3005_s3, %s3005_s3, %s3006_s29  }
  0x3c   :  { %2988 = dma.done.wait [#allocation3], 2048  }
  0x3d   :  { %2989 = vsyncadd [#allocation3], 4294965248 }
  0x3e   :  { %2990 = dma.done.wait [#allocation6], 12288  }
  0x3f   :  { %2991 = vsyncadd [#allocation6], 4294955008 }
  0x40   :  { %2992 = dma.done.wait [#allocation9], 10240  }
  0x41   :  { %2993 = vsyncadd [#allocation9], 4294957056  ;;  %v3007_v0 = vmov 0.0   ;;  %vm3008_vm0 = vmmov 0   ;;  %s3294_s23 = sld [smem:[#allocation17_spill]]  ;;  %v3009_v26 = vmov 0  }
  0x42   :  { %2522 = vmatprep.subr.bf16.mxu0 %v3007_v0  ;;  %2538 = vmatprep.mubr.msk.bf16.mxu0 %vm3008_vm0, %v3007_v0  ;;  %v2566_v4 = vld [vmem:[#allocation2 + $0x74] ss:$8 sps:$4 sm:$0xff]   ;;  %v2568_v5 = vld [vmem:[#allocation2 + $0x70] ss:$8 sps:$4 sm:$0xff]   ;;  %v2569_v7 = vld [vmem:[#allocation2 + $0x64] ss:$8 sps:$4 sm:$0xff]  }
  0x43   :  { %338 = vmatprep.subr.bf16.mxu1 %v2566_v4  ;;  %v2571_v8 = vld [vmem:[#allocation2 + $0x60] ss:$8 sps:$4 sm:$0xff]   ;;  %v2572_v9 = vld [vmem:[#allocation2 + $0x54] ss:$8 sps:$4 sm:$0xff]   ;;  %v2574_v12 = vld [vmem:[#allocation2 + $0x50] ss:$8 sps:$4 sm:$0xff]   ;;  %370 = vmatprep.mubr.bf16.mxu1 %v3009_v26 }
  0x44   :  { %339 = vmatpush1.bf16.msra.mxu1 %v2568_v5  ;;  %v2575_v13 = vld [vmem:[#allocation2 + $0x44] ss:$8 sps:$4 sm:$0xff]   ;;  %v2577_v14 = vld [vmem:[#allocation2 + $0x40] ss:$8 sps:$4 sm:$0xff]   ;;  %v2578_v15 = vld [vmem:[#allocation2 + $0x34] ss:$8 sps:$4 sm:$0xff]  }
  0x45   :  { %340 = vmatprep.subr.bf16.mxu1 %v2569_v7  ;;  %v2580_v17 = vld [vmem:[#allocation2 + $0x30] ss:$8 sps:$4 sm:$0xff]   ;;  %v2581_v18 = vld [vmem:[#allocation2 + $0x24] ss:$8 sps:$4 sm:$0xff]   ;;  %v2583_v20 = vld [vmem:[#allocation2 + $0x20] ss:$8 sps:$4 sm:$0xff]  }
  0x46   :  { %s3295_s21 = sld [smem:[#allocation16_spill]]  ;;  %v2584_v22 = vld [vmem:[#allocation2 + $0x14] ss:$8 sps:$4 sm:$0xff]   ;;  %v2586_v23 = vld [vmem:[#allocation2 + $0x10] ss:$8 sps:$4 sm:$0xff]   ;;  %s3011_s30 = smov [#allocation11]  }
  0x47   :  { %v2558_v1 = vld [vmem:[%s3294_s23 + $0x38] sm:$0xff]   ;;  %v2559_v2 = vld [vmem:[%s3294_s23 + $0x30] sm:$0xff]   ;;  %v2560_v3 = vld [vmem:[%s3294_s23 + $0x28] sm:$0xff]   ;;  %s2278_s18 = sshll.u32 %s3011_s30, 4  ;;  %s2279_s18 = int_to_ptr.vmem [resolvable:$true] %s2278_s18 }
  0x48   :  { %2523 = vmatpush3.bf16.msra.mxu0 %v2558_v1  ;;  %v2561_v6 = vld [vmem:[%s3294_s23 + $0x20] sm:$0xff]   ;;  %v2562_v10 = vld [vmem:[%s3294_s23 + $0x18] sm:$0xff]   ;;  %v2563_v11 = vld [vmem:[%s3294_s23 + $0x10] sm:$0xff]   ;;  %341 = vmatpush1.bf16.msra.mxu1 %v2571_v8  ;;  %s2968_s19 = scalar_lea.vmem %s2279_s18, 128  ;;  %p2973_p12 = scmp.lt.s32.totalorder %s2279_s18, %s2279_s18 }
  0x49   :  { %2524 = vmatprep.subr.bf16.mxu0 %v3007_v0  ;;  %342 = vmatprep.subr.bf16.mxu1 %v2572_v9  ;;  %v2564_v16 = vld [vmem:[%s3294_s23 + $0x8] sm:$0xff]   ;;  %v2565_v19 = vld [vmem:[%s3294_s23] sm:$0xff]   ;;  %v2592_v36 = vld [vmem:[#allocation5 + $0x74] ss:$8 sps:$4 sm:$0xff]   ;;  %p2969_p11 = scmp.ne.s32.totalorder %s2279_s18, %s2968_s19  ;;  %p2974_p13 = scmp.lt.s32.totalorder %s2968_s19, %s2968_s19 }
  0x4a   :  { %v2587_v24 = vld [vmem:[#allocation2 + $0x4] ss:$8 sps:$4 sm:$0xff]   ;;  %v2589_v25 = vld [vmem:[#allocation2] ss:$8 sps:$4 sm:$0xff]   ;;  %v2590_v37 = vld [vmem:[#allocation5 + $0x70] ss:$8 sps:$4 sm:$0xff]  }
  0x4b   :  { %v2289_v27 = vld [vmem:[%s3275_s2] ss:$0 sm:$0xff]  ;;  %v2595_v38 = vld [vmem:[#allocation5 + $0x64] ss:$8 sps:$4 sm:$0xff]   ;;  %v2598_v40 = vld [vmem:[#allocation5 + $0x54] ss:$8 sps:$4 sm:$0xff]   ;;  %p2975_p0 = por %p2974_p13, %p2973_p12 }
  0x4c   :  { %2525 = vmatpush3.bf16.msra.mxu0 %v2559_v2  ;;  %343 = vmatpush1.bf16.msra.mxu1 %v2574_v12  ;;  %v126_v21 = vld [vmem:[%s3295_s21] sm:$0xf]  ;;  %v2596_v41 = vld [vmem:[#allocation5 + $0x50] ss:$8 sps:$4 sm:$0xff]   ;;  %v2601_v42 = vld [vmem:[#allocation5 + $0x44] ss:$8 sps:$4 sm:$0xff]  }
  0x4d   :  { %2526 = vmatprep.subr.bf16.mxu0 %v3007_v0  ;;  %344 = vmatprep.subr.bf16.mxu1 %v2575_v13  ;;  %v2593_v39 = vld [vmem:[#allocation5 + $0x60] ss:$8 sps:$4 sm:$0xff]   ;;  %v2604_v44 = vld [vmem:[#allocation5 + $0x34] ss:$8 sps:$4 sm:$0xff]   ;;  %v2602_v45 = vld [vmem:[#allocation5 + $0x30] ss:$8 sps:$4 sm:$0xff]   ;;  %p2976_p1 = pnand %p2975_p0, %p2969_p11 }
  0x4e   :  { %v2599_v43 = vld [vmem:[#allocation5 + $0x40] ss:$8 sps:$4 sm:$0xff]   ;;  %v2607_v46 = vld [vmem:[#allocation5 + $0x24] ss:$8 sps:$4 sm:$0xff]   ;;  %v2610_v48 = vld [vmem:[#allocation5 + $0x14] ss:$8 sps:$4 sm:$0xff]  }
  0x4f   :  { %v2605_v47 = vld [vmem:[#allocation5 + $0x20] ss:$8 sps:$4 sm:$0xff]   ;;  %v2608_v49 = vld [vmem:[#allocation5 + $0x10] ss:$8 sps:$4 sm:$0xff]   ;;  %v2613_v50 = vld [vmem:[#allocation5 + $0x4] ss:$8 sps:$4 sm:$0xff]  }
  0x50   :  { %2527 = vmatpush3.bf16.msra.mxu0 %v2560_v3  ;;  %345 = vmatpush1.bf16.msra.mxu1 %v2577_v14  ;;  %v2611_v51 = vld [vmem:[#allocation5] ss:$8 sps:$4 sm:$0xff]   ;;  %v2616_v52 = vld [vmem:[#allocation5 + $0xf4] ss:$8 sps:$4 sm:$0xff]   ;;  %v2614_v53 = vld [vmem:[#allocation5 + $0xf0] ss:$8 sps:$4 sm:$0xff]  }
  0x51   :  { %2528 = vmatprep.subr.bf16.mxu0 %v3007_v0  ;;  %346 = vmatprep.subr.bf16.mxu1 %v2578_v15  ;;  %v2619_v54 = vld [vmem:[#allocation5 + $0xe4] ss:$8 sps:$4 sm:$0xff]   ;;  %v2617_v55 = vld [vmem:[#allocation5 + $0xe0] ss:$8 sps:$4 sm:$0xff]   ;;  %v2622_v56 = vld [vmem:[#allocation5 + $0xd4] ss:$8 sps:$4 sm:$0xff]  }
  0x52   :  { %v2620_v57 = vld [vmem:[#allocation5 + $0xd0] ss:$8 sps:$4 sm:$0xff]   ;;  %v2625_v58 = vld [vmem:[#allocation5 + $0xc4] ss:$8 sps:$4 sm:$0xff]   ;;  %v2623_v59 = vld [vmem:[#allocation5 + $0xc0] ss:$8 sps:$4 sm:$0xff]  }
  0x53   :  { %v2628_v60 = vld [vmem:[#allocation5 + $0xb4] ss:$8 sps:$4 sm:$0xff]   ;;  %v2626_v61 = vld [vmem:[#allocation5 + $0xb0] ss:$8 sps:$4 sm:$0xff]   ;;  %v2631_v62 = vld [vmem:[#allocation5 + $0xa4] ss:$8 sps:$4 sm:$0xff]  }
  0x54   :  { %2529 = vmatpush3.bf16.msra.mxu0 %v2561_v6  ;;  %347 = vmatpush1.bf16.msra.mxu1 %v2580_v17  ;;  %v2629_v63 = vld [vmem:[#allocation5 + $0xa0] ss:$8 sps:$4 sm:$0xff]   ;;  %v2632_v1 = vld [vmem:[#allocation5 + $0x90] ss:$8 sps:$4 sm:$0xff]   ;;  %v2637_v2 = vld [vmem:[#allocation5 + $0x84] ss:$8 sps:$4 sm:$0xff]  }
  0x55   :  { %2530 = vmatprep.subr.bf16.mxu0 %v3007_v0  ;;  %348 = vmatprep.subr.bf16.mxu1 %v2581_v18  ;;  %v2635_v3 = vld [vmem:[#allocation5 + $0x80] ss:$8 sps:$4 sm:$0xff]  }
  0x58   :  { %2531 = vmatpush3.bf16.msra.mxu0 %v2562_v10  ;;  %349 = vmatpush1.bf16.msra.mxu1 %v2583_v20 }
  0x59   :  { %2532 = vmatprep.subr.bf16.mxu0 %v3007_v0  ;;  %350 = vmatprep.subr.bf16.mxu1 %v2584_v22 }
  0x5c   :  { %2533 = vmatpush3.bf16.msra.mxu0 %v2563_v11  ;;  %351 = vmatpush1.bf16.msra.mxu1 %v2586_v23 }
  0x5d   :  { %2534 = vmatprep.subr.bf16.mxu0 %v3007_v0  ;;  %352 = vmatprep.subr.bf16.mxu1 %v2587_v24 }
  0x60   :  { %2535 = vmatpush3.bf16.msra.mxu0 %v2564_v16  ;;  %353 = vmatpush1.bf16.msra.mxu1 %v2589_v25 }
  0x61   :  { %2536 = vmatprep.subr.bf16.mxu0 %v3007_v0  ;;  %v2634_v0 = vld [vmem:[#allocation5 + $0x94] ss:$8 sps:$4 sm:$0xff]  }
  0x64   :  { %2537 = vmatpush3.bf16.msra.mxu0 %v2565_v19 }
  0x65   :  { %686 = vmatprep.subr.bf16.mxu0 %v2592_v36 }
  0x67   :  { %2539 = vmatmul.mubr.bf16.vlgmr.msra.gmra.mxu0 %v126_v21 }
  0x68   :  { %687 = vmatpush1.bf16.msra.mxu0 %v2590_v37 }
  0x69   :  { %688 = vmatprep.subr.bf16.mxu0 %v2595_v38 }
  0x6c   :  { %689 = vmatpush1.bf16.msra.mxu0 %v2593_v39 }
  0x6d   :  { %690 = vmatprep.subr.bf16.mxu0 %v2598_v40 }
  0x70   :  { %691 = vmatpush1.bf16.msra.mxu0 %v2596_v41 }
  0x71   :  { %692 = vmatprep.subr.bf16.mxu0 %v2601_v42 }
  0x74   :  { %693 = vmatpush1.bf16.msra.mxu0 %v2599_v43 }
  0x75   :  { %694 = vmatprep.subr.bf16.mxu0 %v2604_v44  ;;  %v3010_v44 = vmov 1966171168  }
  0x78   :  { %695 = vmatpush1.bf16.msra.mxu0 %v2602_v45  ;;  %v423_v45 = vunpack.c.l.s4 %v3010_v44  ;;  %v2682_v44 = vld [vmem:[#allocation7 + $0x4] ss:$16 sps:$4 sm:$0xff]  }
  0x79   :  { %696 = vmatprep.subr.bf16.mxu0 %v2607_v46  ;;  %v425_v46 = vlaneseq }
  0x7c   :  { %697 = vmatpush1.bf16.msra.mxu0 %v2605_v47  ;;  %v424_v47 = vunpack.c.0.s8 %v423_v45  ;;  %v2685_v45 = vld [vmem:[#allocation7 + $0xc] ss:$16 sps:$4 sm:$0xff]  }
  0x7d   :  { %698 = vmatprep.subr.bf16.mxu0 %v2610_v48  ;;  %v3159_v48 = vshrl.u32 %v425_v46, 7  ;;  %v2680_v46 = vld [vmem:[#allocation7] ss:$16 sps:$4 sm:$0xff]  }
  0x80   :  { %699 = vmatpush1.bf16.msra.mxu0 %v2608_v49 }
  0x81   :  { %700 = vmatprep.subr.bf16.mxu0 %v2613_v50  ;;  %v3162_v50 = vsub.s32 %v424_v47, %v3159_v48  ;;  %v2683_v47 = vld [vmem:[#allocation7 + $0x8] ss:$16 sps:$4 sm:$0xff]  }
  0x84   :  { %701 = vmatpush1.bf16.msra.mxu0 %v2611_v51 }
  0x85   :  { %702 = vmatprep.subr.bf16.mxu0 %v2616_v52 }
  0x88   :  { %703 = vmatpush2.bf16.msra.mxu0 %v2614_v53 }
  0x89   :  { %704 = vmatprep.subr.bf16.mxu0 %v2619_v54  ;;  %v414_v54 = vld [vmem:[%s3277_s4] sm:$0x3] }
  0x8c   :  { %705 = vmatpush2.bf16.msra.mxu0 %v2617_v55 }
  0x8d   :  { %706 = vmatprep.subr.bf16.mxu0 %v2622_v56  ;;  %v3170_v56 = vsub.s32 0, %v3159_v48 }
  0x90   :  { %707 = vmatpush2.bf16.msra.mxu0 %v2620_v57  ;;  %v3173_v57 = vsub.s32 1, %v3159_v48 }
  0x91   :  { %708 = vmatprep.subr.bf16.mxu0 %v2625_v58 }
  0x94   :  { %709 = vmatpush2.bf16.msra.mxu0 %v2623_v59 }
  0x95   :  { %710 = vmatprep.subr.bf16.mxu0 %v2628_v60 }
  0x98   :  { %711 = vmatpush2.bf16.msra.mxu0 %v2626_v61 }
  0x99   :  { %712 = vmatprep.subr.bf16.mxu0 %v2631_v62 }
  0x9c   :  { %713 = vmatpush2.bf16.msra.mxu0 %v2629_v63 }
  0x9d   :  { %714 = vmatprep.subr.bf16.mxu0 %v2634_v0 }
  0xa0   :  { %715 = vmatpush2.bf16.msra.mxu0 %v2632_v1  ;;  %v438_v1 = vld [vmem:[%s3278_s5] sm:$0x3] }
  0xa1   :  { %716 = vmatprep.subr.bf16.mxu0 %v2637_v2 }
  0xa4   :  { %717 = vmatpush2.bf16.msra.mxu0 %v2635_v3 }
 0x127   :  { %v232_v28 = vpop.f32.mrf.mxu0 }
 0x128   :  { %v233_v29 = vadd.f32 %v2289_v27, %v232_v28 }
 0x129   :  { %v2540_v30 = vpop.f32.mrf.mxu0 }
 0x12a   :  { %vm238_vm1 = vcmp.gt.f32.partialorder %v233_v29, 0.0  ;;  %v239_v31 = vmul.f32 0.2, %v233_v29 }
 0x12b   :  { %v235_v32 = vpop.f32.mrf.mxu0 }
 0x12c   :  { %v240_v33 = vsel %vm238_vm1, %v233_v29, %v239_v31 }
 0x12d   :  { %v2541_v34 = vpop.f32.mrf.mxu0  ;;  %v241_v35 = vpack.c.bf16 %v240_v33, %v240_v33 }
 0x12f   :  { %371 = vmatmul.mubr.bf16.vlgmr.msra.gmra.mxu1 %v241_v35 }
 0x1ef   :  { %v3147_v4 = vpop.f32.mrf.mxu1 }
 0x1f0   :  { %v379_v5 = vrot.slane %v3147_v4, 4  ;;  %v394_v6 = vmul.f32 %v3147_v4, %v3147_v4 }
 0x1f1   :  { %v3152_v7 = vpop.f32.mrf.mxu1 }
 0x1f2   :  { %v380_v8 = vadd.f32 %v379_v5, %v3147_v4  ;;  %v396_v9 = vrot.slane %v394_v6, 4  ;;  %v385_v10 = vrot.slane %v3152_v7, 4  ;;  %v395_v11 = vmul.f32 %v3152_v7, %v3152_v7 }
 0x1f3   :  { %v376_v12 = vpop.f32.mrf.mxu1 }
 0x1f4   :  { %v381_v13 = vrot.slane %v380_v8, 2  ;;  %v397_v14 = vadd.f32 %v396_v9, %v394_v6  ;;  %v386_v15 = vadd.f32 %v385_v10, %v3152_v7  ;;  %v402_v16 = vrot.slane %v395_v11, 4 }
 0x1f5   :  { %v377_v17 = vpop.f32.mrf.mxu1 }
 0x1f6   :  { %v382_v18 = vadd.f32 %v381_v13, %v380_v8  ;;  %v398_v19 = vrot.slane %v397_v14, 2  ;;  %v387_v20 = vrot.slane %v386_v15, 2  ;;  %v403_v21 = vadd.f32 %v402_v16, %v395_v11 }
 0x1f8   :  { %v383_v22 = vrot.slane %v382_v18, 1  ;;  %v399_v23 = vadd.f32 %v398_v19, %v397_v14  ;;  %v388_v24 = vadd.f32 %v387_v20, %v386_v15  ;;  %v404_v25 = vrot.slane %v403_v21, 2  ;;  %v2638_v19 = vld [vmem:[#allocation7 + $0xe0] ss:$16 sps:$4 sm:$0xff]   ;;  %v2646_v20 = vld [vmem:[#allocation7 + $0xc4] ss:$16 sps:$4 sm:$0xff]  }
 0x1fa   :  { %v384_v26 = vadd.f32 %v383_v22, %v382_v18  ;;  %v400_v27 = vrot.slane %v399_v23, 1  ;;  %v389_v28 = vrot.slane %v388_v24, 1  ;;  %v405_v29 = vadd.f32 %v404_v25, %v403_v21  ;;  %v2640_v18 = vld [vmem:[#allocation7 + $0xe4] ss:$16 sps:$4 sm:$0xff]   ;;  %v2649_v21 = vld [vmem:[#allocation7 + $0xcc] ss:$16 sps:$4 sm:$0xff]  }
 0x1fb   :  { %1225 = vmatprep.subr.bf16.mxu1 %v2640_v18  ;;  %v2644_v22 = vld [vmem:[#allocation7 + $0xc0] ss:$16 sps:$4 sm:$0xff]   ;;  %v2655_v25 = vld [vmem:[#allocation7 + $0xac] ss:$16 sps:$4 sm:$0xff]   ;;  %v2730_v18 = vld [vmem:[#allocation7 + $0x104] ss:$16 sps:$4 sm:$0xff]  }
 0x1fc   :  { %v392_v30 = vmul.f32 0.125, %v384_v26  ;;  %v401_v31 = vadd.f32 %v400_v27, %v399_v23  ;;  %v390_v32 = vadd.f32 %v389_v28, %v388_v24  ;;  %v406_v33 = vrot.slane %v405_v29, 1  ;;  %1226 = vmatpush1.bf16.msra.mxu1 %v2638_v19  ;;  %v2647_v23 = vld [vmem:[#allocation7 + $0xc8] ss:$16 sps:$4 sm:$0xff]   ;;  %v2652_v24 = vld [vmem:[#allocation7 + $0xa4] ss:$16 sps:$4 sm:$0xff]  }
 0x1fd   :  { %1227 = vmatprep.subr.bf16.mxu1 %v2646_v20  ;;  %v2650_v26 = vld [vmem:[#allocation7 + $0xa0] ss:$16 sps:$4 sm:$0xff]   ;;  %v2653_v27 = vld [vmem:[#allocation7 + $0xa8] ss:$16 sps:$4 sm:$0xff]   ;;  %v2658_v28 = vld [vmem:[#allocation7 + $0x84] ss:$16 sps:$4 sm:$0xff]  }
 0x1fe   :  { %v408_v34 = vmul.f32 0.125, %v401_v31  ;;  %v410_v35 = vmul.f32 %v392_v30, %v392_v30  ;;  %v393_v36 = vmul.f32 0.125, %v390_v32  ;;  %v407_v37 = vadd.f32 %v406_v33, %v405_v29  ;;  %v2661_v29 = vld [vmem:[#allocation7 + $0x8c] ss:$16 sps:$4 sm:$0xff]   ;;  %v2659_v31 = vld [vmem:[#allocation7 + $0x88] ss:$16 sps:$4 sm:$0xff]  }
 0x1ff   :  { %v2664_v32 = vld [vmem:[#allocation7 + $0x64] ss:$16 sps:$4 sm:$0xff]   ;;  %v2667_v33 = vld [vmem:[#allocation7 + $0x6c] ss:$16 sps:$4 sm:$0xff]   ;;  %v2731_v19 = vld [vmem:[#allocation7 + $0x108] ss:$16 sps:$4 sm:$0xff]  }
 0x200   :  { %v412_v38 = vsub.f32 %v408_v34, %v410_v35  ;;  %v409_v39 = vmul.f32 0.125, %v407_v37  ;;  %v411_v40 = vmul.f32 %v393_v36, %v393_v36  ;;  %1228 = vmatpush1.bf16.msra.mxu1 %v2644_v22  ;;  %v2662_v34 = vld [vmem:[#allocation7 + $0x60] ss:$16 sps:$4 sm:$0xff]   ;;  %v2665_v35 = vld [vmem:[#allocation7 + $0x68] ss:$16 sps:$4 sm:$0xff]  }
 0x201   :  { %1229 = vmatprep.subr.bf16.mxu1 %v2652_v24  ;;  %v2673_v37 = vld [vmem:[#allocation7 + $0x4c] ss:$16 sps:$4 sm:$0xff]  }
 0x202   :  { %v415_v41 = vadd.f32 1e-05, %v412_v38  ;;  %v413_v42 = vsub.f32 %v409_v39, %v411_v40  ;;  %v2668_v38 = vld [vmem:[#allocation7 + $0x40] ss:$16 sps:$4 sm:$0xff]   ;;  %v2671_v39 = vld [vmem:[#allocation7 + $0x48] ss:$16 sps:$4 sm:$0xff]  }
 0x203   :  { %v2676_v40 = vld [vmem:[#allocation7 + $0x24] ss:$16 sps:$4 sm:$0xff]  }
 0x204   :  { %v416_v43 = vadd.f32 1e-05, %v413_v42  ;;  %2846 = vrsqrt.f32 %v415_v41  ;;  %1230 = vmatpush1.bf16.msra.mxu1 %v2650_v26  ;;  %v2679_v41 = vld [vmem:[#allocation7 + $0x2c] ss:$16 sps:$4 sm:$0xff]   ;;  %v2674_v42 = vld [vmem:[#allocation7 + $0x20] ss:$16 sps:$4 sm:$0xff]  }
 0x205   :  { %1231 = vmatprep.subr.bf16.mxu1 %v2658_v28 }
 0x206   :  { %2848 = vrsqrt.f32 %v416_v43  ;;  %v2677_v43 = vld [vmem:[#allocation7 + $0x28] ss:$16 sps:$4 sm:$0xff]  }
 0x211   :  { %v2847_v49 = vpop.eup %2846 }
 0x213   :  { %v2849_v51 = vpop.eup %2848 }
 0x214   :  { %v421_v52 = vcombine.low %v2847_v49, %v2849_v51  ;;  %v2688_v49 = vld [vmem:[#allocation7 + $0x1e4] ss:$16 sps:$4 sm:$0xff]   ;;  %v2691_v51 = vld [vmem:[#allocation7 + $0x1ec] ss:$16 sps:$4 sm:$0xff]  }
 0x216   :  { %v428_v53 = vrot.slane %v421_v52, %v3162_v50  ;;  %v2686_v52 = vld [vmem:[#allocation7 + $0x1e0] ss:$16 sps:$4 sm:$0xff]  }
 0x218   :  { %v435_v55 = vrot.slane %v428_v53, %v3162_v50  ;;  %v2689_v53 = vld [vmem:[#allocation7 + $0x1e8] ss:$16 sps:$4 sm:$0xff]  }
 0x21a   :  { %v437_v58 = vmul.f32 %v435_v55, %v414_v54  ;;  %v2694_v54 = vld [vmem:[#allocation7 + $0x1c4] ss:$16 sps:$4 sm:$0xff]   ;;  %v2697_v55 = vld [vmem:[#allocation7 + $0x1cc] ss:$16 sps:$4 sm:$0xff]  }
 0x21c   :  { %v443_v59 = vrot.slane %v437_v58, %v3170_v56  ;;  %v447_v60 = vrot.slane %v437_v58, %v3173_v57  ;;  %v2692_v58 = vld [vmem:[#allocation7 + $0x1c0] ss:$16 sps:$4 sm:$0xff]  }
 0x21e   :  { %v450_v61 = vmul.f32 %v443_v59, %v392_v30  ;;  %v451_v62 = vmul.f32 %v447_v60, %v393_v36  ;;  %v471_v5 = vmul.f32 %v443_v59, %v3147_v4  ;;  %v472_v6 = vmul.f32 %v447_v60, %v3152_v7  ;;  %v2643_v4 = vld [vmem:[#allocation7 + $0xec] ss:$16 sps:$4 sm:$0xff]   ;;  %v2641_v7 = vld [vmem:[#allocation7 + $0xe8] ss:$16 sps:$4 sm:$0xff]   ;;  %v2656_v30 = vld [vmem:[#allocation7 + $0x80] ss:$16 sps:$4 sm:$0xff]  }
 0x21f   :  { %1266 = vmatprep.subr.bf16.mxu0 %v2643_v4  ;;  %1232 = vmatpush1.bf16.msra.mxu1 %v2656_v30  ;;  %v2670_v36 = vld [vmem:[#allocation7 + $0x44] ss:$16 sps:$4 sm:$0xff]   ;;  %v2695_v59 = vld [vmem:[#allocation7 + $0x1c8] ss:$16 sps:$4 sm:$0xff]   ;;  %v2728_v4 = vld [vmem:[#allocation7 + $0x100] ss:$16 sps:$4 sm:$0xff]  }
 0x220   :  { %v454_v63 = vcombine.low %v450_v61, %v451_v62  ;;  %1233 = vmatprep.subr.bf16.mxu1 %v2664_v32  ;;  %v2700_v60 = vld [vmem:[#allocation7 + $0x1a4] ss:$16 sps:$4 sm:$0xff]   ;;  %v2703_v61 = vld [vmem:[#allocation7 + $0x1ac] ss:$16 sps:$4 sm:$0xff]   ;;  %v2698_v62 = vld [vmem:[#allocation7 + $0x1a0] ss:$16 sps:$4 sm:$0xff]  }
 0x222   :  { %v461_v0 = vrot.slane %v454_v63, %v3162_v50  ;;  %v2701_v63 = vld [vmem:[#allocation7 + $0x1a8] ss:$16 sps:$4 sm:$0xff]  }
 0x223   :  { %1234 = vmatpush1.bf16.msra.mxu1 %v2662_v34 }
 0x224   :  { %v468_v2 = vrot.slane %v461_v0, %v3162_v50  ;;  %1235 = vmatprep.subr.bf16.mxu1 %v2670_v36  ;;  %v2706_v0 = vld [vmem:[#allocation7 + $0x184] ss:$16 sps:$4 sm:$0xff]  }
 0x226   :  { %v470_v3 = vsub.f32 %v438_v1, %v468_v2  ;;  %v2709_v1 = vld [vmem:[#allocation7 + $0x18c] ss:$16 sps:$4 sm:$0xff]   ;;  %v2704_v2 = vld [vmem:[#allocation7 + $0x180] ss:$16 sps:$4 sm:$0xff]  }
 0x227   :  { %1236 = vmatpush1.bf16.msra.mxu1 %v2668_v38 }
 0x228   :  { %v477_v8 = vrot.slane %v470_v3, %v3170_v56  ;;  %v481_v9 = vrot.slane %v470_v3, %v3173_v57  ;;  %1237 = vmatprep.subr.bf16.mxu1 %v2676_v40  ;;  %v2707_v3 = vld [vmem:[#allocation7 + $0x188] ss:$16 sps:$4 sm:$0xff]  }
 0x22a   :  { %v485_v10 = vadd.f32 %v481_v9, %v472_v6  ;;  %v484_v11 = vadd.f32 %v477_v8, %v471_v5  ;;  %v2712_v5 = vld [vmem:[#allocation7 + $0x164] ss:$16 sps:$4 sm:$0xff]   ;;  %v2715_v6 = vld [vmem:[#allocation7 + $0x16c] ss:$16 sps:$4 sm:$0xff]   ;;  %v2710_v8 = vld [vmem:[#allocation7 + $0x160] ss:$16 sps:$4 sm:$0xff]  }
 0x22b   :  { %1238 = vmatpush1.bf16.msra.mxu1 %v2674_v42  ;;  %v2713_v9 = vld [vmem:[#allocation7 + $0x168] ss:$16 sps:$4 sm:$0xff]  }
 0x22c   :  { %vm487_vm2 = vcmp.gt.f32.partialorder %v485_v10, 0.0  ;;  %v489_v12 = vmul.f32 0.2, %v485_v10  ;;  %vm486_vm3 = vcmp.gt.f32.partialorder %v484_v11, 0.0  ;;  %v488_v13 = vmul.f32 0.2, %v484_v11  ;;  %1239 = vmatprep.subr.bf16.mxu1 %v2682_v44 }
 0x22e   :  { %v491_v14 = vsel %vm487_vm2, %v485_v10, %v489_v12  ;;  %v490_v15 = vsel %vm486_vm3, %v484_v11, %v488_v13  ;;  %v2718_v10 = vld [vmem:[#allocation7 + $0x144] ss:$16 sps:$4 sm:$0xff]   ;;  %v2721_v11 = vld [vmem:[#allocation7 + $0x14c] ss:$16 sps:$4 sm:$0xff]   ;;  %v2716_v12 = vld [vmem:[#allocation7 + $0x140] ss:$16 sps:$4 sm:$0xff]  }
 0x22f   :  { %v493_v16 = vpack.c.bf16 %v491_v14, %v491_v14  ;;  %v492_v17 = vpack.c.bf16 %v490_v15, %v490_v15  ;;  %1240 = vmatpush1.bf16.msra.mxu1 %v2680_v46  ;;  %v2719_v13 = vld [vmem:[#allocation7 + $0x148] ss:$16 sps:$4 sm:$0xff]   ;;  %v2724_v14 = vld [vmem:[#allocation7 + $0x124] ss:$16 sps:$4 sm:$0xff]   ;;  %v2727_v15 = vld [vmem:[#allocation7 + $0x12c] ss:$16 sps:$4 sm:$0xff]  }
 0x230   :  { %1241 = vmatprep.subr.bf16.mxu1 %v2688_v49 }
 0x231   :  { %718 = vmatprep.mubr.bf16.mxu0 %v493_v16  ;;  %v2722_v16 = vld [vmem:[#allocation7 + $0x120] ss:$16 sps:$4 sm:$0xff]  }
 0x232   :  { %719 = vmatmul.mubr.bf16.vlgmr.msra.gmra.mxu0 %v492_v17  ;;  %v2725_v17 = vld [vmem:[#allocation7 + $0x128] ss:$16 sps:$4 sm:$0xff]  }
 0x233   :  { %1267 = vmatpush1.bf16.msra.mxu0 %v2641_v7  ;;  %1242 = vmatpush2.bf16.msra.mxu1 %v2686_v52  ;;  %v2733_v7 = vld [vmem:[#allocation7 + $0x10c] ss:$16 sps:$4 sm:$0xff]  }
 0x234   :  { %1268 = vmatprep.subr.bf16.mxu0 %v2649_v21  ;;  %1243 = vmatprep.subr.bf16.mxu1 %v2694_v54 }
 0x237   :  { %1269 = vmatpush1.bf16.msra.mxu0 %v2647_v23  ;;  %1244 = vmatpush2.bf16.msra.mxu1 %v2692_v58 }
 0x238   :  { %1270 = vmatprep.subr.bf16.mxu0 %v2655_v25  ;;  %1245 = vmatprep.subr.bf16.mxu1 %v2700_v60 }
 0x23b   :  { %1271 = vmatpush1.bf16.msra.mxu0 %v2653_v27  ;;  %1246 = vmatpush2.bf16.msra.mxu1 %v2698_v62 }
 0x23c   :  { %1272 = vmatprep.subr.bf16.mxu0 %v2661_v29  ;;  %1247 = vmatprep.subr.bf16.mxu1 %v2706_v0 }
 0x23f   :  { %1273 = vmatpush1.bf16.msra.mxu0 %v2659_v31  ;;  %1248 = vmatpush2.bf16.msra.mxu1 %v2704_v2 }
 0x240   :  { %1274 = vmatprep.subr.bf16.mxu0 %v2667_v33  ;;  %1249 = vmatprep.subr.bf16.mxu1 %v2712_v5  ;;  %v761_v5 = vld [vmem:[%s3280_s7] sm:$0x3] }
 0x243   :  { %1275 = vmatpush1.bf16.msra.mxu0 %v2665_v35  ;;  %1250 = vmatpush2.bf16.msra.mxu1 %v2710_v8 }
 0x244   :  { %1276 = vmatprep.subr.bf16.mxu0 %v2673_v37  ;;  %1251 = vmatprep.subr.bf16.mxu1 %v2718_v10 }
 0x247   :  { %1277 = vmatpush1.bf16.msra.mxu0 %v2671_v39  ;;  %1252 = vmatpush2.bf16.msra.mxu1 %v2716_v12 }
 0x248   :  { %1278 = vmatprep.subr.bf16.mxu0 %v2679_v41  ;;  %1253 = vmatprep.subr.bf16.mxu1 %v2724_v14 }
 0x24b   :  { %1279 = vmatpush1.bf16.msra.mxu0 %v2677_v43  ;;  %1254 = vmatpush2.bf16.msra.mxu1 %v2722_v16 }
 0x24c   :  { %1280 = vmatprep.subr.bf16.mxu0 %v2685_v45  ;;  %1255 = vmatprep.subr.bf16.mxu1 %v2730_v18 }
 0x24f   :  { %1281 = vmatpush1.bf16.msra.mxu0 %v2683_v47  ;;  %1256 = vmatpush2.bf16.msra.mxu1 %v2728_v4 }
 0x250   :  { %1282 = vmatprep.subr.bf16.mxu0 %v2691_v51 }
 0x253   :  { %1283 = vmatpush2.bf16.msra.mxu0 %v2689_v53 }
 0x254   :  { %1284 = vmatprep.subr.bf16.mxu0 %v2697_v55 }
 0x257   :  { %1285 = vmatpush2.bf16.msra.mxu0 %v2695_v59 }
 0x258   :  { %1286 = vmatprep.subr.bf16.mxu0 %v2703_v61 }
 0x25b   :  { %1287 = vmatpush2.bf16.msra.mxu0 %v2701_v63 }
 0x25c   :  { %1288 = vmatprep.subr.bf16.mxu0 %v2709_v1 }
 0x25f   :  { %1289 = vmatpush2.bf16.msra.mxu0 %v2707_v3 }
 0x260   :  { %1290 = vmatprep.subr.bf16.mxu0 %v2715_v6 }
 0x263   :  { %1291 = vmatpush2.bf16.msra.mxu0 %v2713_v9 }
 0x264   :  { %1292 = vmatprep.subr.bf16.mxu0 %v2721_v11 }
 0x267   :  { %1293 = vmatpush2.bf16.msra.mxu0 %v2719_v13 }
 0x268   :  { %1294 = vmatprep.subr.bf16.mxu0 %v2727_v15  ;;  %v785_v15 = vld [vmem:[%s3281_s8] sm:$0x3] }
 0x26b   :  { %1295 = vmatpush2.bf16.msra.mxu0 %v2725_v17 }
 0x26c   :  { %1296 = vmatprep.subr.bf16.mxu0 %v2733_v7 }
 0x26f   :  { %1297 = vmatpush2.bf16.msra.mxu0 %v2731_v19 }
 0x2f2   :  { %v720_v20 = vpop.f32.mrf.mxu0 }
 0x2f3   :  { %v727_v21 = vrot.slane %v720_v20, 4  ;;  %v741_v22 = vmul.f32 %v720_v20, %v720_v20 }
 0x2f4   :  { %v722_v23 = vpop.f32.mrf.mxu0 }
 0x2f5   :  { %v728_v24 = vadd.f32 %v727_v21, %v720_v20  ;;  %v743_v25 = vrot.slane %v741_v22, 4  ;;  %v733_v26 = vrot.slane %v722_v23, 4  ;;  %v742_v27 = vmul.f32 %v722_v23, %v722_v23 }
 0x2f6   :  { %v724_v28 = vpop.f32.mrf.mxu0 }
 0x2f7   :  { %v729_v29 = vrot.slane %v728_v24, 2  ;;  %v744_v30 = vadd.f32 %v743_v25, %v741_v22  ;;  %v734_v31 = vadd.f32 %v733_v26, %v722_v23  ;;  %v749_v32 = vrot.slane %v742_v27, 4 }
 0x2f8   :  { %v725_v33 = vpop.f32.mrf.mxu0 }
 0x2f9   :  { %v730_v34 = vadd.f32 %v729_v29, %v728_v24  ;;  %v745_v35 = vrot.slane %v744_v30, 2  ;;  %v735_v36 = vrot.slane %v734_v31, 2  ;;  %v750_v37 = vadd.f32 %v749_v32, %v742_v27  ;;  %v2742_v32 = vld [vmem:[#allocation8 + $0x64] ss:$8 sps:$4 sm:$0xff]  }
 0x2fa   :  { %v2745_v33 = vld [vmem:[#allocation8 + $0x164] ss:$8 sps:$4 sm:$0xff]  }
 0x2fb   :  { %v731_v38 = vrot.slane %v730_v34, 1  ;;  %v746_v39 = vadd.f32 %v745_v35, %v744_v30  ;;  %v736_v40 = vadd.f32 %v735_v36, %v734_v31  ;;  %v751_v41 = vrot.slane %v750_v37, 2  ;;  %v2734_v30 = vld [vmem:[#allocation8 + $0x70] ss:$8 sps:$4 sm:$0xff]   ;;  %v2743_v35 = vld [vmem:[#allocation8 + $0x160] ss:$8 sps:$4 sm:$0xff]  }
 0x2fc   :  { %v2737_v31 = vld [vmem:[#allocation8 + $0x170] ss:$8 sps:$4 sm:$0xff]   ;;  %v2748_v36 = vld [vmem:[#allocation8 + $0x54] ss:$8 sps:$4 sm:$0xff]  }
 0x2fd   :  { %v732_v42 = vadd.f32 %v731_v38, %v730_v34  ;;  %v747_v43 = vrot.slane %v746_v39, 1  ;;  %v737_v44 = vrot.slane %v736_v40, 1  ;;  %v752_v45 = vadd.f32 %v751_v41, %v750_v37  ;;  %v2740_v34 = vld [vmem:[#allocation8 + $0x60] ss:$8 sps:$4 sm:$0xff]   ;;  %v2751_v37 = vld [vmem:[#allocation8 + $0x154] ss:$8 sps:$4 sm:$0xff]  }
 0x2fe   :  { %v2746_v38 = vld [vmem:[#allocation8 + $0x50] ss:$8 sps:$4 sm:$0xff]   ;;  %v2757_v41 = vld [vmem:[#allocation8 + $0x144] ss:$8 sps:$4 sm:$0xff]  }
 0x2ff   :  { %v739_v46 = vmul.f32 0.125, %v732_v42  ;;  %v748_v47 = vadd.f32 %v747_v43, %v746_v39  ;;  %v738_v49 = vadd.f32 %v737_v44, %v736_v40  ;;  %v753_v51 = vrot.slane %v752_v45, 1  ;;  %v2749_v39 = vld [vmem:[#allocation8 + $0x150] ss:$8 sps:$4 sm:$0xff]   ;;  %v2754_v40 = vld [vmem:[#allocation8 + $0x44] ss:$8 sps:$4 sm:$0xff]  }
 0x300   :  { %v2752_v42 = vld [vmem:[#allocation8 + $0x40] ss:$8 sps:$4 sm:$0xff]   ;;  %v2760_v44 = vld [vmem:[#allocation8 + $0x34] ss:$8 sps:$4 sm:$0xff]  }
 0x301   :  { %v755_v52 = vmul.f32 0.125, %v748_v47  ;;  %v757_v53 = vmul.f32 %v739_v46, %v739_v46  ;;  %v740_v54 = vmul.f32 0.125, %v738_v49  ;;  %v754_v55 = vadd.f32 %v753_v51, %v752_v45  ;;  %v2755_v43 = vld [vmem:[#allocation8 + $0x140] ss:$8 sps:$4 sm:$0xff]   ;;  %v2763_v45 = vld [vmem:[#allocation8 + $0x134] ss:$8 sps:$4 sm:$0xff]  }
 0x302   :  { %v2761_v47 = vld [vmem:[#allocation8 + $0x130] ss:$8 sps:$4 sm:$0xff]   ;;  %v2766_v49 = vld [vmem:[#allocation8 + $0x24] ss:$8 sps:$4 sm:$0xff]  }
 0x303   :  { %v759_v58 = vsub.f32 %v755_v52, %v757_v53  ;;  %v756_v59 = vmul.f32 0.125, %v754_v55  ;;  %v758_v60 = vmul.f32 %v740_v54, %v740_v54  ;;  %v2769_v51 = vld [vmem:[#allocation8 + $0x124] ss:$8 sps:$4 sm:$0xff]   ;;  %v2764_v52 = vld [vmem:[#allocation8 + $0x20] ss:$8 sps:$4 sm:$0xff]  }
 0x304   :  { %v2767_v53 = vld [vmem:[#allocation8 + $0x120] ss:$8 sps:$4 sm:$0xff]   ;;  %v2775_v55 = vld [vmem:[#allocation8 + $0x114] ss:$8 sps:$4 sm:$0xff]  }
 0x305   :  { %v762_v61 = vadd.f32 1e-05, %v759_v58  ;;  %v760_v62 = vsub.f32 %v756_v59, %v758_v60  ;;  %v2770_v58 = vld [vmem:[#allocation8 + $0x10] ss:$8 sps:$4 sm:$0xff]   ;;  %v2778_v60 = vld [vmem:[#allocation8 + $0x4] ss:$8 sps:$4 sm:$0xff]  }
 0x306   :  { %v2773_v59 = vld [vmem:[#allocation8 + $0x110] ss:$8 sps:$4 sm:$0xff]  }
 0x307   :  { %v763_v63 = vadd.f32 1e-05, %v760_v62  ;;  %2850 = vrsqrt.f32 %v762_v61  ;;  %v2781_v61 = vld [vmem:[#allocation8 + $0x104] ss:$8 sps:$4 sm:$0xff]   ;;  %v2776_v62 = vld [vmem:[#allocation8] ss:$8 sps:$4 sm:$0xff]  }
 0x309   :  { %2852 = vrsqrt.f32 %v763_v63  ;;  %v2779_v63 = vld [vmem:[#allocation8 + $0x100] ss:$8 sps:$4 sm:$0xff]  }
 0x314   :  { %v2851_v0 = vpop.eup %2850 }
 0x316   :  { %v2853_v1 = vpop.eup %2852 }
 0x317   :  { %v768_v2 = vcombine.low %v2851_v0, %v2853_v1  ;;  %v2784_v0 = vld [vmem:[#allocation8 + $0xf4] ss:$8 sps:$4 sm:$0xff]  }
 0x318   :  { %v2787_v1 = vld [vmem:[#allocation8 + $0x1f4] ss:$8 sps:$4 sm:$0xff]  }
 0x319   :  { %v775_v3 = vrot.slane %v768_v2, %v3162_v50  ;;  %v2782_v2 = vld [vmem:[#allocation8 + $0xf0] ss:$8 sps:$4 sm:$0xff]  }
 0x31b   :  { %v782_v6 = vrot.slane %v775_v3, %v3162_v50  ;;  %v2785_v3 = vld [vmem:[#allocation8 + $0x1f0] ss:$8 sps:$4 sm:$0xff]  }
 0x31d   :  { %v784_v8 = vmul.f32 %v782_v6, %v761_v5  ;;  %v2790_v5 = vld [vmem:[#allocation8 + $0xe4] ss:$8 sps:$4 sm:$0xff]  }
 0x31e   :  { %v2793_v6 = vld [vmem:[#allocation8 + $0x1e4] ss:$8 sps:$4 sm:$0xff]  }
 0x31f   :  { %v790_v9 = vrot.slane %v784_v8, %v3170_v56  ;;  %v794_v10 = vrot.slane %v784_v8, %v3173_v57  ;;  %v2788_v8 = vld [vmem:[#allocation8 + $0xe0] ss:$8 sps:$4 sm:$0xff]  }
 0x321   :  { %v797_v11 = vmul.f32 %v790_v9, %v739_v46  ;;  %v798_v12 = vmul.f32 %v794_v10, %v740_v54  ;;  %v818_v18 = vmul.f32 %v790_v9, %v720_v20  ;;  %v819_v4 = vmul.f32 %v794_v10, %v722_v23  ;;  %v2736_v20 = vld [vmem:[#allocation8 + $0x74] ss:$8 sps:$4 sm:$0xff]   ;;  %v2758_v46 = vld [vmem:[#allocation8 + $0x30] ss:$8 sps:$4 sm:$0xff]   ;;  %v2791_v9 = vld [vmem:[#allocation8 + $0x1e0] ss:$8 sps:$4 sm:$0xff]  }
 0x322   :  { %v2739_v23 = vld [vmem:[#allocation8 + $0x174] ss:$8 sps:$4 sm:$0xff]   ;;  %1899 = vmatprep.subr.bf16.mxu1 %v2736_v20  ;;  %v2826_v20 = vld [vmem:[#allocation8 + $0x84] ss:$8 sps:$4 sm:$0xff]  }
 0x323   :  { %v801_v13 = vcombine.low %v797_v11, %v798_v12  ;;  %1940 = vmatprep.subr.bf16.mxu0 %v2739_v23  ;;  %v2772_v54 = vld [vmem:[#allocation8 + $0x14] ss:$8 sps:$4 sm:$0xff]   ;;  %v2794_v12 = vld [vmem:[#allocation8 + $0xd0] ss:$8 sps:$4 sm:$0xff]   ;;  %v2829_v23 = vld [vmem:[#allocation8 + $0x184] ss:$8 sps:$4 sm:$0xff]  }
 0x324   :  { %v2796_v10 = vld [vmem:[#allocation8 + $0xd4] ss:$8 sps:$4 sm:$0xff]  }
 0x325   :  { %v808_v14 = vrot.slane %v801_v13, %v3162_v50  ;;  %v2799_v11 = vld [vmem:[#allocation8 + $0x1d4] ss:$8 sps:$4 sm:$0xff]   ;;  %v2797_v13 = vld [vmem:[#allocation8 + $0x1d0] ss:$8 sps:$4 sm:$0xff]  }
 0x327   :  { %v815_v16 = vrot.slane %v808_v14, %v3162_v50  ;;  %v2802_v14 = vld [vmem:[#allocation8 + $0xc4] ss:$8 sps:$4 sm:$0xff]  }
 0x329   :  { %v817_v17 = vsub.f32 %v785_v15, %v815_v16  ;;  %v2805_v15 = vld [vmem:[#allocation8 + $0x1c4] ss:$8 sps:$4 sm:$0xff]   ;;  %v2800_v16 = vld [vmem:[#allocation8 + $0xc0] ss:$8 sps:$4 sm:$0xff]  }
 0x32b   :  { %v824_v19 = vrot.slane %v817_v17, %v3170_v56  ;;  %v828_v7 = vrot.slane %v817_v17, %v3173_v57  ;;  %v2803_v17 = vld [vmem:[#allocation8 + $0x1c0] ss:$8 sps:$4 sm:$0xff]  }
 0x32d   :  { %v832_v21 = vadd.f32 %v828_v7, %v819_v4  ;;  %v831_v22 = vadd.f32 %v824_v19, %v818_v18  ;;  %v2808_v18 = vld [vmem:[#allocation8 + $0xb4] ss:$8 sps:$4 sm:$0xff]   ;;  %v2806_v19 = vld [vmem:[#allocation8 + $0xb0] ss:$8 sps:$4 sm:$0xff]  }
 0x32e   :  { %v2811_v4 = vld [vmem:[#allocation8 + $0x1b4] ss:$8 sps:$4 sm:$0xff]   ;;  %v2809_v7 = vld [vmem:[#allocation8 + $0x1b0] ss:$8 sps:$4 sm:$0xff]  }
 0x32f   :  { %vm834_vm4 = vcmp.gt.f32.partialorder %v832_v21, 0.0  ;;  %v836_v24 = vmul.f32 0.2, %v832_v21  ;;  %vm833_vm5 = vcmp.gt.f32.partialorder %v831_v22, 0.0  ;;  %v835_v25 = vmul.f32 0.2, %v831_v22 }
 0x331   :  { %v838_v26 = vsel %vm834_vm4, %v832_v21, %v836_v24  ;;  %v837_v27 = vsel %vm833_vm5, %v831_v22, %v835_v25  ;;  %v2814_v21 = vld [vmem:[#allocation8 + $0xa4] ss:$8 sps:$4 sm:$0xff]   ;;  %v2812_v24 = vld [vmem:[#allocation8 + $0xa0] ss:$8 sps:$4 sm:$0xff]  }
 0x332   :  { %v840_v28 = vpack.c.bf16 %v838_v26, %v838_v26  ;;  %v839_v29 = vpack.c.bf16 %v837_v27, %v837_v27  ;;  %v2817_v22 = vld [vmem:[#allocation8 + $0x1a4] ss:$8 sps:$4 sm:$0xff]   ;;  %v2815_v25 = vld [vmem:[#allocation8 + $0x1a0] ss:$8 sps:$4 sm:$0xff]   ;;  %v2820_v26 = vld [vmem:[#allocation8 + $0x94] ss:$8 sps:$4 sm:$0xff]  }
 0x333   :  { %v2823_v27 = vld [vmem:[#allocation8 + $0x194] ss:$8 sps:$4 sm:$0xff]  }
 0x334   :  { %1257 = vmatprep.mubr.bf16.mxu1 %v840_v28  ;;  %1298 = vmatprep.mubr.bf16.mxu0 %v840_v28  ;;  %v2818_v28 = vld [vmem:[#allocation8 + $0x90] ss:$8 sps:$4 sm:$0xff]  }
 0x335   :  { %1258 = vmatmul.mubr.bf16.vlgmr.msra.gmra.mxu1 %v839_v29  ;;  %1299 = vmatmul.mubr.bf16.vlgmr.msra.gmra.mxu0 %v839_v29  ;;  %v2821_v29 = vld [vmem:[#allocation8 + $0x190] ss:$8 sps:$4 sm:$0xff]  }
 0x336   :  { %1900 = vmatpush1.bf16.msra.mxu1 %v2734_v30  ;;  %1941 = vmatpush1.bf16.msra.mxu0 %v2737_v31  ;;  %v2824_v30 = vld [vmem:[#allocation8 + $0x80] ss:$8 sps:$4 sm:$0xff]  }
 0x337   :  { %1901 = vmatprep.subr.bf16.mxu1 %v2742_v32  ;;  %1942 = vmatprep.subr.bf16.mxu0 %v2745_v33  ;;  %v2827_v31 = vld [vmem:[#allocation8 + $0x180] ss:$8 sps:$4 sm:$0xff]  }
 0x33a   :  { %1902 = vmatpush1.bf16.msra.mxu1 %v2740_v34  ;;  %1943 = vmatpush1.bf16.msra.mxu0 %v2743_v35 }
 0x33b   :  { %1903 = vmatprep.subr.bf16.mxu1 %v2748_v36  ;;  %1944 = vmatprep.subr.bf16.mxu0 %v2751_v37 }
 0x33e   :  { %1904 = vmatpush1.bf16.msra.mxu1 %v2746_v38  ;;  %1945 = vmatpush1.bf16.msra.mxu0 %v2749_v39 }
 0x33f   :  { %1905 = vmatprep.subr.bf16.mxu1 %v2754_v40  ;;  %1946 = vmatprep.subr.bf16.mxu0 %v2757_v41 }
 0x342   :  { %1906 = vmatpush1.bf16.msra.mxu1 %v2752_v42  ;;  %1947 = vmatpush1.bf16.msra.mxu0 %v2755_v43 }
 0x343   :  { %1907 = vmatprep.subr.bf16.mxu1 %v2760_v44  ;;  %1948 = vmatprep.subr.bf16.mxu0 %v2763_v45 }
 0x346   :  { %1908 = vmatpush1.bf16.msra.mxu1 %v2758_v46  ;;  %1949 = vmatpush1.bf16.msra.mxu0 %v2761_v47 }
 0x347   :  { %1909 = vmatprep.subr.bf16.mxu1 %v2766_v49  ;;  %1950 = vmatprep.subr.bf16.mxu0 %v2769_v51 }
 0x34a   :  { %1910 = vmatpush1.bf16.msra.mxu1 %v2764_v52  ;;  %1951 = vmatpush1.bf16.msra.mxu0 %v2767_v53 }
 0x34b   :  { %1911 = vmatprep.subr.bf16.mxu1 %v2772_v54  ;;  %1952 = vmatprep.subr.bf16.mxu0 %v2775_v55 }
 0x34e   :  { %1912 = vmatpush1.bf16.msra.mxu1 %v2770_v58  ;;  %1953 = vmatpush1.bf16.msra.mxu0 %v2773_v59 }
 0x34f   :  { %1913 = vmatprep.subr.bf16.mxu1 %v2778_v60  ;;  %1954 = vmatprep.subr.bf16.mxu0 %v2781_v61 }
 0x352   :  { %1914 = vmatpush1.bf16.msra.mxu1 %v2776_v62  ;;  %1955 = vmatpush1.bf16.msra.mxu0 %v2779_v63 }
 0x353   :  { %1915 = vmatprep.subr.bf16.mxu1 %v2784_v0  ;;  %1956 = vmatprep.subr.bf16.mxu0 %v2787_v1 }
 0x356   :  { %1916 = vmatpush2.bf16.msra.mxu1 %v2782_v2  ;;  %1957 = vmatpush2.bf16.msra.mxu0 %v2785_v3 }
 0x357   :  { %1917 = vmatprep.subr.bf16.mxu1 %v2790_v5  ;;  %1958 = vmatprep.subr.bf16.mxu0 %v2793_v6 }
 0x35a   :  { %1918 = vmatpush2.bf16.msra.mxu1 %v2788_v8  ;;  %1959 = vmatpush2.bf16.msra.mxu0 %v2791_v9 }
 0x35b   :  { %1919 = vmatprep.subr.bf16.mxu1 %v2796_v10  ;;  %1960 = vmatprep.subr.bf16.mxu0 %v2799_v11 }
 0x35e   :  { %1920 = vmatpush2.bf16.msra.mxu1 %v2794_v12  ;;  %1961 = vmatpush2.bf16.msra.mxu0 %v2797_v13 }
 0x35f   :  { %1921 = vmatprep.subr.bf16.mxu1 %v2802_v14  ;;  %1962 = vmatprep.subr.bf16.mxu0 %v2805_v15 }
 0x362   :  { %1922 = vmatpush2.bf16.msra.mxu1 %v2800_v16  ;;  %1963 = vmatpush2.bf16.msra.mxu0 %v2803_v17 }
 0x363   :  { %1923 = vmatprep.subr.bf16.mxu1 %v2808_v18  ;;  %1964 = vmatprep.subr.bf16.mxu0 %v2811_v4 }
 0x366   :  { %1924 = vmatpush2.bf16.msra.mxu1 %v2806_v19  ;;  %1965 = vmatpush2.bf16.msra.mxu0 %v2809_v7 }
 0x367   :  { %1925 = vmatprep.subr.bf16.mxu1 %v2814_v21  ;;  %1966 = vmatprep.subr.bf16.mxu0 %v2817_v22 }
 0x36a   :  { %1926 = vmatpush2.bf16.msra.mxu1 %v2812_v24  ;;  %1967 = vmatpush2.bf16.msra.mxu0 %v2815_v25 }
 0x36b   :  { %1927 = vmatprep.subr.bf16.mxu1 %v2820_v26  ;;  %1968 = vmatprep.subr.bf16.mxu0 %v2823_v27 }
 0x36e   :  { %1928 = vmatpush2.bf16.msra.mxu1 %v2818_v28  ;;  %1969 = vmatpush2.bf16.msra.mxu0 %v2821_v29 }
 0x36f   :  { %1929 = vmatprep.subr.bf16.mxu1 %v2826_v20  ;;  %1970 = vmatprep.subr.bf16.mxu0 %v2829_v23 }
 0x372   :  { %1930 = vmatpush2.bf16.msra.mxu1 %v2824_v30  ;;  %1971 = vmatpush2.bf16.msra.mxu0 %v2827_v31 }
 0x3f5   :  { %v3200_v32 = vpop.f32.mrf.mxu1  ;;  %v3202_v33 = vpop.f32.mrf.mxu0 }
 0x3f6   :  { %v1307_v34 = vrot.slane %v3200_v32, 4  ;;  %v1335_v35 = vmul.f32 %v3200_v32, %v3200_v32  ;;  %v1319_v36 = vrot.slane %v3202_v33, 4  ;;  %v1337_v37 = vmul.f32 %v3202_v33, %v3202_v33 }
 0x3f7   :  { %v3210_v38 = vpop.f32.mrf.mxu1  ;;  %v3212_v39 = vpop.f32.mrf.mxu0 }
 0x3f8   :  { %v1308_v40 = vadd.f32 %v1307_v34, %v3200_v32  ;;  %v1339_v41 = vrot.slane %v1335_v35, 4  ;;  %v1320_v42 = vadd.f32 %v1319_v36, %v3202_v33  ;;  %v1351_v43 = vrot.slane %v1337_v37, 4 }
 0x3f9   :  { %v1313_v44 = vrot.slane %v3210_v38, 4  ;;  %v1336_v45 = vmul.f32 %v3210_v38, %v3210_v38  ;;  %v1325_v46 = vrot.slane %v3212_v39, 4  ;;  %v1338_v47 = vmul.f32 %v3212_v39, %v3212_v39  ;;  %v1263_v49 = vpop.f32.mrf.mxu1  ;;  %v1304_v51 = vpop.f32.mrf.mxu0 }
 0x3fa   :  { %v1309_v52 = vrot.slane %v1308_v40, 2  ;;  %v1340_v53 = vadd.f32 %v1339_v41, %v1335_v35  ;;  %v1321_v54 = vrot.slane %v1320_v42, 2  ;;  %v1352_v55 = vadd.f32 %v1351_v43, %v1337_v37 }
 0x3fb   :  { %v1314_v58 = vadd.f32 %v1313_v44, %v3210_v38  ;;  %v1345_v59 = vrot.slane %v1336_v45, 4  ;;  %v1326_v60 = vadd.f32 %v1325_v46, %v3212_v39  ;;  %v1357_v61 = vrot.slane %v1338_v47, 4  ;;  %v1264_v62 = vpop.f32.mrf.mxu1  ;;  %v1305_v63 = vpop.f32.mrf.mxu0 }
 0x3fc   :  { %v1310_v0 = vadd.f32 %v1309_v52, %v1308_v40  ;;  %v1341_v1 = vrot.slane %v1340_v53, 2  ;;  %v1322_v2 = vadd.f32 %v1321_v54, %v1320_v42  ;;  %v1353_v3 = vrot.slane %v1352_v55, 2 }
 0x3fd   :  { %v1315_v5 = vrot.slane %v1314_v58, 2  ;;  %v1346_v6 = vadd.f32 %v1345_v59, %v1336_v45  ;;  %v1327_v8 = vrot.slane %v1326_v60, 2  ;;  %v1358_v9 = vadd.f32 %v1357_v61, %v1338_v47 }
 0x3fe   :  { %v1311_v10 = vrot.slane %v1310_v0, 1  ;;  %v1342_v11 = vadd.f32 %v1341_v1, %v1340_v53  ;;  %v1323_v12 = vrot.slane %v1322_v2, 1  ;;  %v1354_v13 = vadd.f32 %v1353_v3, %v1352_v55 }
 0x3ff   :  { %v1316_v14 = vadd.f32 %v1315_v5, %v1314_v58  ;;  %v1347_v15 = vrot.slane %v1346_v6, 2  ;;  %v1328_v16 = vadd.f32 %v1327_v8, %v1326_v60  ;;  %v1359_v17 = vrot.slane %v1358_v9, 2 }
 0x400   :  { %v1312_v18 = vadd.f32 %v1311_v10, %v1310_v0  ;;  %v1343_v4 = vrot.slane %v1342_v11, 1  ;;  %v1324_v19 = vadd.f32 %v1323_v12, %v1322_v2  ;;  %v1355_v7 = vrot.slane %v1354_v13, 1 }
 0x401   :  { %v1317_v21 = vrot.slane %v1316_v14, 1  ;;  %v1348_v22 = vadd.f32 %v1347_v15, %v1346_v6  ;;  %v1329_v24 = vrot.slane %v1328_v16, 1  ;;  %v1360_v25 = vadd.f32 %v1359_v17, %v1358_v9  ;;  %v1375_v6 = vld [vmem:[%s3283_s10] sm:$0xf] }
 0x402   :  { %v1331_v26 = vmul.f32 0.125, %v1312_v18  ;;  %v1344_v27 = vadd.f32 %v1343_v4, %v1342_v11  ;;  %v1333_v28 = vmul.f32 0.125, %v1324_v19  ;;  %v1356_v29 = vadd.f32 %v1355_v7, %v1354_v13 }
 0x403   :  { %v1318_v20 = vadd.f32 %v1317_v21, %v1316_v14  ;;  %v1349_v23 = vrot.slane %v1348_v22, 1  ;;  %v1330_v30 = vadd.f32 %v1329_v24, %v1328_v16  ;;  %v1361_v31 = vrot.slane %v1360_v25, 1 }
 0x404   :  { %v1363_v34 = vmul.f32 0.125, %v1344_v27  ;;  %v1367_v35 = vmul.f32 %v1331_v26, %v1331_v26  ;;  %v1365_v36 = vmul.f32 0.125, %v1356_v29  ;;  %v1369_v37 = vmul.f32 %v1333_v28, %v1333_v28 }
 0x405   :  { %v1332_v40 = vmul.f32 0.125, %v1318_v20  ;;  %v1350_v41 = vadd.f32 %v1349_v23, %v1348_v22  ;;  %v1334_v42 = vmul.f32 0.125, %v1330_v30  ;;  %v1362_v43 = vadd.f32 %v1361_v31, %v1360_v25 }
 0x406   :  { %v1371_v44 = vsub.f32 %v1363_v34, %v1367_v35  ;;  %v1373_v45 = vsub.f32 %v1365_v36, %v1369_v37  ;;  %v1426_v9 = vsub.s32 2, %v3159_v48  ;;  %v1430_v10 = vsub.s32 3, %v3159_v48  ;;  %v1414_v48 = vld [vmem:[%s3284_s11] sm:$0xf] }
 0x407   :  { %v1364_v46 = vmul.f32 0.125, %v1350_v41  ;;  %v1368_v47 = vmul.f32 %v1332_v40, %v1332_v40  ;;  %v1366_v49 = vmul.f32 0.125, %v1362_v43  ;;  %v1370_v51 = vmul.f32 %v1334_v42, %v1334_v42 }
 0x408   :  { %v1376_v52 = vadd.f32 1e-05, %v1371_v44  ;;  %v1378_v53 = vadd.f32 1e-05, %v1373_v45 }
 0x409   :  { %v1372_v54 = vsub.f32 %v1364_v46, %v1368_v47  ;;  %v1374_v55 = vsub.f32 %v1366_v49, %v1370_v51  ;;  %v2830_v51 = vld [vmem:[#allocation10 + $0x78] sm:$0xff]  }
 0x40a   :  { %2854 = vrsqrt.f32 %v1376_v52  ;;  %v2831_v52 = vld [vmem:[#allocation10 + $0x38] sm:$0xff]   ;;  %2500 = vmatprep.subr.bf16.mxu1 %v2830_v51 }
 0x40b   :  { %v1377_v58 = vadd.f32 1e-05, %v1372_v54  ;;  %v1379_v59 = vadd.f32 1e-05, %v1374_v55  ;;  %2856 = vrsqrt.f32 %v1378_v53  ;;  %v2832_v53 = vld [vmem:[#allocation10 + $0x70] sm:$0xff]   ;;  %v2834_v55 = vld [vmem:[#allocation10 + $0x68] sm:$0xff]  }
 0x40c   :  { %v2833_v54 = vld [vmem:[#allocation10 + $0x30] sm:$0xff]  }
 0x40d   :  { %2858 = vrsqrt.f32 %v1377_v58  ;;  %v2835_v58 = vld [vmem:[#allocation10 + $0x28] sm:$0xff]  }
 0x40e   :  { %2860 = vrsqrt.f32 %v1379_v59  ;;  %v2836_v59 = vld [vmem:[#allocation10 + $0x60] sm:$0xff]  }
 0x417   :  { %v2855_v60 = vpop.eup %2854 }
 0x418   :  { %v2857_v61 = vpop.eup %2856 }
 0x41a   :  { %v2859_v62 = vpop.eup %2858 }
 0x41b   :  { %v2861_v63 = vpop.eup %2860  ;;  %v1388_v0 = vcombine.low %v2855_v60, %v2859_v62  ;;  %v2837_v60 = vld [vmem:[#allocation10 + $0x20] sm:$0xff]   ;;  %v2839_v62 = vld [vmem:[#allocation10 + $0x18] sm:$0xff]  }
 0x41c   :  { %v1389_v1 = vcombine.low %v2857_v61, %v2861_v63  ;;  %v2838_v61 = vld [vmem:[#allocation10 + $0x58] sm:$0xff]   ;;  %v2840_v63 = vld [vmem:[#allocation10 + $0x50] sm:$0xff]  }
 0x41d   :  { %v1396_v2 = vrot.slane %v1388_v0, %v3162_v50  ;;  %v2841_v0 = vld [vmem:[#allocation10 + $0x10] sm:$0xff]  }
 0x41e   :  { %v1403_v3 = vrot.slane %v1389_v1, %v3162_v50  ;;  %v2842_v1 = vld [vmem:[#allocation10 + $0x48] sm:$0xff]  }
 0x420   :  { %v1404_v5 = vcombine.low %v1396_v2, %v1403_v3  ;;  %v2843_v2 = vld [vmem:[#allocation10 + $0x8] sm:$0xff]   ;;  %v2844_v3 = vld [vmem:[#allocation10 + $0x40] sm:$0xff]  }
 0x422   :  { %v1411_v8 = vrot.slane %v1404_v5, %v3162_v50  ;;  %v2845_v5 = vld [vmem:[#allocation10] sm:$0xff]  }
 0x424   :  { %v1413_v11 = vmul.f32 %v1411_v8, %v1375_v6 }
 0x426   :  { %v1419_v12 = vrot.slane %v1413_v11, %v3170_v56  ;;  %v1423_v13 = vrot.slane %v1413_v11, %v3173_v57  ;;  %v1427_v14 = vrot.slane %v1413_v11, %v1426_v9  ;;  %v1431_v15 = vrot.slane %v1413_v11, %v1430_v10 }
 0x428   :  { %v1436_v16 = vmul.f32 %v1419_v12, %v1331_v26  ;;  %v1437_v17 = vmul.f32 %v1423_v13, %v1332_v40  ;;  %v1438_v18 = vmul.f32 %v1427_v14, %v1333_v28  ;;  %v1439_v4 = vmul.f32 %v1431_v15, %v1334_v42 }
 0x429   :  { %v1473_v29 = vmul.f32 %v1431_v15, %v3212_v39  ;;  %v1471_v26 = vmul.f32 %v1423_v13, %v3210_v38  ;;  %v1470_v28 = vmul.f32 %v1419_v12, %v3200_v32  ;;  %v1472_v20 = vmul.f32 %v1427_v14, %v3202_v33 }
 0x42a   :  { %v1444_v19 = vcombine.low %v1436_v16, %v1437_v17  ;;  %v1445_v7 = vcombine.low %v1438_v18, %v1439_v4 }
 0x42c   :  { %v1452_v21 = vrot.slane %v1444_v19, %v3162_v50  ;;  %v1459_v22 = vrot.slane %v1445_v7, %v3162_v50 }
 0x42e   :  { %v1460_v24 = vcombine.low %v1452_v21, %v1459_v22 }
 0x430   :  { %v1467_v25 = vrot.slane %v1460_v24, %v3162_v50 }
 0x432   :  { %v1469_v27 = vsub.f32 %v1414_v48, %v1467_v25 }
 0x434   :  { %v1490_v23 = vrot.slane %v1469_v27, %v1430_v10  ;;  %v1482_v30 = vrot.slane %v1469_v27, %v3173_v57  ;;  %v1478_v31 = vrot.slane %v1469_v27, %v3170_v56  ;;  %v1486_v34 = vrot.slane %v1469_v27, %v1426_v9 }
 0x436   :  { %v1498_v35 = vadd.f32 %v1490_v23, %v1473_v29  ;;  %v1496_v36 = vadd.f32 %v1482_v30, %v1471_v26  ;;  %v1495_v37 = vadd.f32 %v1478_v31, %v1470_v28  ;;  %v1497_v40 = vadd.f32 %v1486_v34, %v1472_v20 }
 0x438   :  { %vm1500_vm6 = vcmp.gt.f32.partialorder %v1496_v36, 0.0  ;;  %v1504_v41 = vmul.f32 0.2, %v1496_v36  ;;  %vm1502_vm7 = vcmp.gt.f32.partialorder %v1498_v35, 0.0  ;;  %v1506_v39 = vmul.f32 0.2, %v1498_v35 }
 0x439   :  { %vm1499_vm8 = vcmp.gt.f32.partialorder %v1495_v37, 0.0  ;;  %v1503_v38 = vmul.f32 0.2, %v1495_v37  ;;  %vm1501_vm9 = vcmp.gt.f32.partialorder %v1497_v40, 0.0  ;;  %v1505_v32 = vmul.f32 0.2, %v1497_v40 }
 0x43a   :  { %v1508_v42 = vsel %vm1500_vm6, %v1496_v36, %v1504_v41  ;;  %v1510_v33 = vsel %vm1502_vm7, %v1498_v35, %v1506_v39 }
 0x43b   :  { %v1512_v43 = vpack.c.bf16 %v1508_v42, %v1508_v42  ;;  %v1514_v44 = vpack.c.bf16 %v1510_v33, %v1510_v33  ;;  %v1507_v45 = vsel %vm1499_vm8, %v1495_v37, %v1503_v38  ;;  %v1509_v46 = vsel %vm1501_vm9, %v1497_v40, %v1505_v32 }
 0x43c   :  { %v1511_v47 = vpack.c.bf16 %v1507_v45, %v1507_v45  ;;  %v1513_v49 = vpack.c.bf16 %v1509_v46, %v1509_v46 }
 0x43d   :  { %1931 = vmatprep.mubr.bf16.mxu1 %v1512_v43  ;;  %1972 = vmatprep.mubr.bf16.mxu0 %v1514_v44 }
 0x43e   :  { %1932 = vmatmul.mubr.bf16.vlgmr.msra.gmra.mxu1 %v1511_v47  ;;  %1973 = vmatmul.mubr.bf16.vlgmr.msra.gmra.mxu0 %v1513_v49 }
 0x43f   :  { %2501 = vmatpush3.bf16.msra.mxu1 %v2831_v52 }
 0x440   :  { %2502 = vmatprep.subr.bf16.mxu1 %v2832_v53 }
 0x443   :  { %2503 = vmatpush3.bf16.msra.mxu1 %v2833_v54 }
 0x444   :  { %2504 = vmatprep.subr.bf16.mxu1 %v2834_v55 }
 0x447   :  { %2505 = vmatpush3.bf16.msra.mxu1 %v2835_v58  ;;  %v2015_v58 = vld [vmem:[%s3286_s13] sm:$0x3] }
 0x448   :  { %2506 = vmatprep.subr.bf16.mxu1 %v2836_v59 }
 0x44b   :  { %2507 = vmatpush3.bf16.msra.mxu1 %v2837_v60 }
 0x44c   :  { %2508 = vmatprep.subr.bf16.mxu1 %v2838_v61 }
 0x44f   :  { %2509 = vmatpush3.bf16.msra.mxu1 %v2839_v62 }
 0x450   :  { %2510 = vmatprep.subr.bf16.mxu1 %v2840_v63 }
 0x453   :  { %2511 = vmatpush3.bf16.msra.mxu1 %v2841_v0 }
 0x454   :  { %2512 = vmatprep.subr.bf16.mxu1 %v2842_v1 }
 0x457   :  { %2513 = vmatpush3.bf16.msra.mxu1 %v2843_v2 }
 0x458   :  { %2514 = vmatprep.subr.bf16.mxu1 %v2844_v3  ;;  %v2039_v3 = vld [vmem:[%s3287_s14] sm:$0x3] }
 0x45b   :  { %2515 = vmatpush3.bf16.msra.mxu1 %v2845_v5 }
 0x4fe   :  { %v1933_v6 = vpop.f32.mrf.mxu1  ;;  %v1974_v8 = vpop.f32.mrf.mxu0 }
 0x4ff   :  { %v3246_v9 = vadd.f32 %v1974_v8, %v1933_v6 }
 0x500   :  { %v1935_v10 = vpop.f32.mrf.mxu1  ;;  %v1976_v11 = vpop.f32.mrf.mxu0 }
 0x501   :  { %v1981_v12 = vrot.slane %v3246_v9, 4  ;;  %v1995_v13 = vmul.f32 %v3246_v9, %v3246_v9  ;;  %v1977_v14 = vadd.f32 %v1976_v11, %v1935_v10 }
 0x502   :  { %v1937_v15 = vpop.f32.mrf.mxu1  ;;  %v1978_v16 = vpop.f32.mrf.mxu0 }
 0x503   :  { %v1982_v17 = vadd.f32 %v1981_v12, %v3246_v9  ;;  %v1997_v18 = vrot.slane %v1995_v13, 4  ;;  %v1987_v4 = vrot.slane %v1977_v14, 4  ;;  %v1996_v19 = vmul.f32 %v1977_v14, %v1977_v14 }
 0x504   :  { %v1938_v7 = vpop.f32.mrf.mxu1  ;;  %v1979_v21 = vpop.f32.mrf.mxu0 }
 0x505   :  { %v1983_v22 = vrot.slane %v1982_v17, 2  ;;  %v1998_v24 = vadd.f32 %v1997_v18, %v1995_v13  ;;  %v1988_v48 = vadd.f32 %v1987_v4, %v1977_v14  ;;  %v2003_v25 = vrot.slane %v1996_v19, 4 }
 0x507   :  { %v1984_v27 = vadd.f32 %v1983_v22, %v1982_v17  ;;  %v1999_v29 = vrot.slane %v1998_v24, 2  ;;  %v1989_v26 = vrot.slane %v1988_v48, 2  ;;  %v2004_v28 = vadd.f32 %v2003_v25, %v1996_v19 }
 0x509   :  { %v1985_v20 = vrot.slane %v1984_v27, 1  ;;  %v2000_v23 = vadd.f32 %v1999_v29, %v1998_v24  ;;  %v1990_v30 = vadd.f32 %v1989_v26, %v1988_v48  ;;  %v2005_v31 = vrot.slane %v2004_v28, 2 }
 0x50b   :  { %v1986_v34 = vadd.f32 %v1985_v20, %v1984_v27  ;;  %v2001_v35 = vrot.slane %v2000_v23, 1  ;;  %v1991_v36 = vrot.slane %v1990_v30, 1  ;;  %v2006_v37 = vadd.f32 %v2005_v31, %v2004_v28 }
 0x50d   :  { %v1993_v40 = vmul.f32 0.125, %v1986_v34  ;;  %v2002_v41 = vadd.f32 %v2001_v35, %v2000_v23  ;;  %v1992_v39 = vadd.f32 %v1991_v36, %v1990_v30  ;;  %v2007_v38 = vrot.slane %v2006_v37, 1 }
 0x50f   :  { %v2009_v32 = vmul.f32 0.125, %v2002_v41  ;;  %v2011_v42 = vmul.f32 %v1993_v40, %v1993_v40  ;;  %v1994_v33 = vmul.f32 0.125, %v1992_v39  ;;  %v2008_v43 = vadd.f32 %v2007_v38, %v2006_v37 }
 0x511   :  { %v2013_v44 = vsub.f32 %v2009_v32, %v2011_v42  ;;  %v2010_v45 = vmul.f32 0.125, %v2008_v43  ;;  %v2012_v46 = vmul.f32 %v1994_v33, %v1994_v33 }
 0x513   :  { %v2016_v47 = vadd.f32 1e-05, %v2013_v44  ;;  %v2014_v49 = vsub.f32 %v2010_v45, %v2012_v46 }
 0x515   :  { %v2017_v51 = vadd.f32 1e-05, %v2014_v49  ;;  %2862 = vrsqrt.f32 %v2016_v47 }
 0x517   :  { %2864 = vrsqrt.f32 %v2017_v51 }
 0x522   :  { %v2863_v52 = vpop.eup %2862 }
 0x524   :  { %v2865_v53 = vpop.eup %2864 }
 0x525   :  { %v2022_v54 = vcombine.low %v2863_v52, %v2865_v53 }
 0x527   :  { %v2029_v55 = vrot.slane %v2022_v54, %v3162_v50 }
 0x529   :  { %v2036_v59 = vrot.slane %v2029_v55, %v3162_v50 }
 0x52b   :  { %v2038_v60 = vmul.f32 %v2036_v59, %v2015_v58 }
 0x52d   :  { %v2044_v61 = vrot.slane %v2038_v60, %v3170_v56  ;;  %v2048_v62 = vrot.slane %v2038_v60, %v3173_v57 }
 0x52f   :  { %v2051_v63 = vmul.f32 %v2044_v61, %v1993_v40  ;;  %v2052_v0 = vmul.f32 %v2048_v62, %v1994_v33  ;;  %v2073_v8 = vmul.f32 %v2048_v62, %v1977_v14  ;;  %v2072_v11 = vmul.f32 %v2044_v61, %v3246_v9 }
 0x531   :  { %v2055_v1 = vcombine.low %v2051_v63, %v2052_v0 }
 0x533   :  { %v2062_v2 = vrot.slane %v2055_v1, %v3162_v50 }
 0x535   :  { %v2069_v5 = vrot.slane %v2062_v2, %v3162_v50 }
 0x537   :  { %v2071_v6 = vsub.f32 %v2039_v3, %v2069_v5 }
 0x539   :  { %v2082_v10 = vrot.slane %v2071_v6, %v3173_v57  ;;  %v2078_v12 = vrot.slane %v2071_v6, %v3170_v56  ;;  %v2474_v57 = vld [vmem:[%s3289_s16] ss:$0 sm:$0xff] }
 0x53b   :  { %v2086_v13 = vadd.f32 %v2082_v10, %v2073_v8  ;;  %v2085_v15 = vadd.f32 %v2078_v12, %v2072_v11 }
 0x53d   :  { %vm2088_vm10 = vcmp.gt.f32.partialorder %v2086_v13, 0.0  ;;  %v2090_v16 = vmul.f32 0.2, %v2086_v13  ;;  %vm2087_vm11 = vcmp.gt.f32.partialorder %v2085_v15, 0.0  ;;  %v2089_v17 = vmul.f32 0.2, %v2085_v15 }
 0x53f   :  { %v2092_v18 = vsel %vm2088_vm10, %v2086_v13, %v2090_v16  ;;  %v2091_v4 = vsel %vm2087_vm11, %v2085_v15, %v2089_v17 }
 0x540   :  { %v2094_v19 = vpack.c.bf16 %v2092_v18, %v2092_v18  ;;  %v2093_v7 = vpack.c.bf16 %v2091_v4, %v2091_v4 }
 0x542   :  { %2262 = vmatprep.mubr.bf16.mxu1 %v2094_v19 }
 0x543   :  { %2263 = vmatmul.mubr.bf16.vlgmr.msra.gmra.mxu1 %v2093_v7 }
 0x603   :  { %v2516_v50 = vpop.f32.mrf.mxu1 }
 0x605   :  { %v2517_v9 = vpop.f32.mrf.mxu1 }
 0x606   :  { %v2518_v14 = vadd.f32 %v2517_v9, %v2516_v50 }
 0x607   :  { %v2519_v56 = vpop.f32.mrf.mxu1 }
 0x608   :  { %v2265_v21 = vadd.f32 %v2518_v14, %v2474_v57 }
 0x609   :  { %v2520_v22 = vpop.f32.mrf.mxu1 }
 0x60a   :  { %2866 = vtanh.f32 %v2265_v21 }
 0x617   :  { %v2867_v24 = vpop.eup %2866 }
 0x618   :  { %2271 = vst [vmem:[#allocation11] sm:$0xff] %v2867_v24 }
 0x619   :  { %2979 = shalt.err (!%p2976_p1)
}
 0x61a   :  { %2281 = dma.vmem_to_hbm [thread:$0]  %s2279_s18, 128, %s3290_s17, [#allocation4]  }
 0x61b   :  { %2994 = dma.done.wait [#allocation4], 128  }
 0x61c   :  { %2995 = vsyncadd [#allocation4], 4294967168 }
 0x61d   :  { %2285 = vsyncpa [#allocation3], 1 }
 0x61e   :  { %2286 = vsyncpa [#allocation6], 1 }
 0x61f   :  { %2287 = vsyncpa [#allocation9], 1 }
 0x620   :  { %2288 = vsyncpa [#allocation4], 1 }

</bundles_post_ra>
